<compile_context>
chip_gen: v7x
topology: tpu7x:2x2x1
jax: 0.10.0
libtpu: 0.0.40
codegen_flags: <defaults>
</compile_context>

<pallas_src>
import functools

import jax
import jax.numpy as jnp
from jax.experimental import pallas as pl
from jax.experimental.pallas import tpu as pltpu

BN_EPS = 1e-5
LAYER_CFG = [(64, 3, 1), (128, 4, 2), (256, 6, 2), (512, 3, 2)]  # (width, blocks, stride)
EXPANSION = 4
LANE = 128


# ----------------------- hardware-aware tiling -----------------------
def _round_up(x, m):
    return ((x + m - 1) // m) * m


def _query_vmem_capacity():
    try:
        return int(pltpu.get_tpu_info().vmem_capacity_bytes)
    except Exception:
        return 64 * 1024 * 1024  # conservative (v7x-sized) fallback


_VMEM_CAPACITY = _query_vmem_capacity()
_VMEM_LIMIT = min(48 * 1024 * 1024, (_VMEM_CAPACITY * 3) // 4)
# 128 MiB parts (v5e/v6e): allow 1024-row M tiles; 64 MiB (v7x): keep 512.
_TM_CAP = 1024 if _VMEM_CAPACITY >= 96 * 1024 * 1024 else 512


def _tile_m(m):
    """M tile for the GEMM kernel.  Small M -> one full block (always legal);
    large M -> biggest tile <= cap that still leaves >= 2 blocks (megacore)."""
    if m <= 1024:
        return m
    for t in (1024, 512, 256, 128):
        if t <= _TM_CAP and m >= 2 * t:
            return t
    return 128


_COMPILER_PARAMS = pltpu.CompilerParams(
    dimension_semantics=("parallel",),
    vmem_limit_bytes=_VMEM_LIMIT,
)


# ----------------------- fused GEMM (+shift [+residual] [+ReLU]) -----------------------
def _gemm_kernel(a_ref, w_ref, b_ref, o_ref, *, relu):
    y = jnp.dot(a_ref[...], w_ref[...], preferred_element_type=jnp.float32)
    y = y + b_ref[...]
    if relu:
        y = jnp.maximum(y, 0.0)
    o_ref[...] = y.astype(o_ref.dtype)


def _gemm_res_kernel(a_ref, w_ref, b_ref, r_ref, o_ref, *, relu):
    y = jnp.dot(a_ref[...], w_ref[...], preferred_element_type=jnp.float32)
    y = y + b_ref[...] + r_ref[...].astype(jnp.float32)
    if relu:
        y = jnp.maximum(y, 0.0)
    o_ref[...] = y.astype(o_ref.dtype)


def gemm_bn_act(a, p, residual=None, *, relu, out_dtype=jnp.bfloat16):
    """out = act(a @ wmat + shift [+ residual]).

    Weight (full K x N) and shift have constant index maps -> DMA'd to VMEM once
    and kept resident across all M blocks; BN scale is already folded into wmat.
    Single full-K block => no accumulator scratch, epilogue runs inline."""
    wmat, shift = p["wmat"], p["shift"]
    m, k = a.shape
    kw_, n_p = wmat.shape
    assert k == kw_, (k, kw_)
    a = a.astype(jnp.bfloat16)

    tm = _tile_m(m)
    grid = (pl.cdiv(m, tm),)

    inputs = [a, wmat, shift]
    in_specs = [
        pl.BlockSpec((tm, k), lambda i: (i, 0)),
        pl.BlockSpec((k, n_p), lambda i: (0, 0)),   # resident weight
        pl.BlockSpec((1, n_p), lambda i: (0, 0)),   # resident shift
    ]
    if residual is not None:
        inputs.append(residual.astype(jnp.bfloat16))
        in_specs.append(pl.BlockSpec((tm, n_p), lambda i: (i, 0)))
        kernel = functools.partial(_gemm_res_kernel, relu=relu)
    else:
        kernel = functools.partial(_gemm_kernel, relu=relu)

    return pl.pallas_call(
        kernel,
        out_shape=jax.ShapeDtypeStruct((m, n_p), out_dtype),
        grid=grid,
        in_specs=in_specs,
        out_specs=pl.BlockSpec((tm, n_p), lambda i: (i, 0)),
        compiler_params=_COMPILER_PARAMS,
    )(*inputs)


# ----------------------- im2col-free 3x3 stride-1 conv -----------------------
def _conv3x3_s1_kernel(x_ref, w_ref, b_ref, o_ref, *, ho, wo, wp, relu):
    # x_ref : (1, (ho+3)*wp, Cin)  spatially flattened, padded image
    #         (pad: top/left/right 1 row/col, bottom 2 rows so every tap slab
    #          stays in bounds).
    # w_ref : (9, Cin, Cout) bf16 taps (BN scale folded in), resident in VMEM.
    # b_ref : (1, Cout) f32 shift.       o_ref : (1, ho, wo, Cout) bf16.
    rows = ho * wp
    acc = None
    for t in range(9):                       # 9 taps, each one MXU matmul
        di, dj = divmod(t, 3)
        off = di * wp + dj
        a = x_ref[0, off:off + rows, :]      # contiguous "wide row" slab
        part = jnp.dot(a, w_ref[t], preferred_element_type=jnp.float32)
        acc = part if acc is None else acc + part
    acc = acc + b_ref[...]
    if relu:
        acc = jnp.maximum(acc, 0.0)
    y = acc.astype(o_ref.dtype)
    for h in range(ho):                      # drop the 2 junk columns per wide row
        o_ref[0, h] = y[h * wp:h * wp + wo, :]


def conv3x3_s1_bn_act(x, p, *, relu=True):
    """3x3 / stride-1 / pad-1 conv + folded BN + ReLU, no materialized im2col."""
    n, h, w, c = x.shape
    w9, shift = p["w9"], p["shift"]
    assert w9.shape[1] == c, (w9.shape, c)
    cout = w9.shape[2]
    wp = w + 2
    xp = jnp.pad(x.astype(jnp.bfloat16), ((0, 0), (1, 2), (1, 1), (0, 0)))
    xf = xp.reshape(n, (h + 3) * wp, c)      # contiguous collapse -> free reshape

    kernel = functools.partial(_conv3x3_s1_kernel, ho=h, wo=w, wp=wp, relu=relu)
    return pl.pallas_call(
        kernel,
        out_shape=jax.ShapeDtypeStruct((n, h, w, cout), jnp.bfloat16),
        grid=(n,),
        in_specs=[
            pl.BlockSpec((1, (h + 3) * wp, c), lambda b: (b, 0, 0)),
            pl.BlockSpec((9, c, cout), lambda b: (0, 0, 0)),   # resident weights
            pl.BlockSpec((1, cout), lambda b: (0, 0)),
        ],
        out_specs=pl.BlockSpec((1, h, w, cout), lambda b: (b, 0, 0, 0)),
        compiler_params=_COMPILER_PARAMS,
    )(xf, w9, shift)


# ----------------------- remaining conv glue -----------------------
def _im2col(x, kh, kw, stride, pad):
    # Used only for the 7x7 stem and the three stride-2 3x3 convs.
    if pad:
        x = jnp.pad(x, ((0, 0), (pad, pad), (pad, pad), (0, 0)))
    n, h, w, c = x.shape
    ho = (h - kh) // stride + 1
    wo = (w - kw) // stride + 1
    cols = []
    for i in range(kh):
        for j in range(kw):
            cols.append(x[:, i:i + stride * ho:stride, j:j + stride * wo:stride, :])
    patches = jnp.stack(cols, axis=3)        # (n, ho, wo, kh*kw, c)
    return patches.reshape(n * ho * wo, kh * kw * c), ho, wo


def conv_gemm_bn_act(x, p, *, kh, kw, stride, pad, relu, residual=None,
                     out_dtype=jnp.bfloat16):
    """Conv expressed as a fused GEMM (+BN shift [+residual] [+ReLU])."""
    n, h, w, c = x.shape
    x = x.astype(jnp.bfloat16)
    if kh == 1 and kw == 1 and pad == 0:
        if stride > 1:
            # TODO(synk): the 1x1 stride-2 downsample still materializes an XLA
            # strided gather; an in-kernel strided gather would remove this copy.
            x = x[:, ::stride, ::stride, :]
        ho, wo = x.shape[1], x.shape[2]
        a = x.reshape(n * ho * wo, c)
    else:
        # TODO(synk): only the 7x7 stem and the three stride-2 3x3 convs still use a
        # materialized im2col; all stride-1 3x3 convs are im2col-free (spatial kernel).
        a, ho, wo = _im2col(x, kh, kw, stride, pad)
        kp = p["wmat"].shape[0]
        if a.shape[1] != kp:                 # stem conv only: K=147 -> 256
            a = jnp.pad(a, ((0, 0), (0, kp - a.shape[1])))
    r = None
    if residual is not None:
        r = residual.reshape(a.shape[0], p["wmat"].shape[1])
    y = gemm_bn_act(a, p, r, relu=relu, out_dtype=out_dtype)
    return y.reshape(n, ho, wo, y.shape[-1])


def max_pool_3x3_s2(x):
    # TODO(synk): pooling stays on lax.reduce_window (one extra XLA pass over the
    # post-stem activation) rather than a dedicated / fused Pallas kernel.
    neg_inf = jnp.array(-jnp.inf, dtype=x.dtype)
    return jax.lax.reduce_window(
        x, neg_inf, jax.lax.max,
        window_dimensions=(1, 3, 3, 1),
        window_strides=(1, 2, 2, 1),
        padding=((0, 0), (1, 1), (1, 1), (0, 0)))


# ----------------------- deterministic parameter construction -----------------------
def _conv_w(key, cout, cin, kh, kw):
    std = (2.0 / (cin * kh * kw)) ** 0.5
    return jax.random.normal(key, (cout, cin, kh, kw), jnp.float32) * std


def _bn_p(c):
    return dict(gamma=jnp.ones((c,), jnp.float32), beta=jnp.zeros((c,), jnp.float32),
                mean=jnp.zeros((c,), jnp.float32), var=jnp.ones((c,), jnp.float32))


def make_resnet50_params(key, num_classes):
    cnt = [0]

    def nk():
        cnt[0] += 1
        return jax.random.fold_in(key, cnt[0])

    params = {"conv1": _conv_w(nk(), 64, 3, 7, 7), "bn1": _bn_p(64)}
    in_c = 64
    layers = []
    for width, n_blocks, stride in LAYER_CFG:
        blocks = []
        for b in range(n_blocks):
            s = stride if b == 0 else 1
            blk = {
                "conv1": _conv_w(nk(), width, in_c, 1, 1), "bn1": _bn_p(width),
                "conv2": _conv_w(nk(), width, width, 3, 3), "bn2": _bn_p(width),
                "conv3": _conv_w(nk(), width * EXPANSION, width, 1, 1),
                "bn3": _bn_p(width * EXPANSION),
            }
            if s != 1 or in_c != width * EXPANSION:
                blk["ds_conv"] = _conv_w(nk(), width * EXPANSION, in_c, 1, 1)
                blk["ds_bn"] = _bn_p(width * EXPANSION)
            blocks.append(blk)
            in_c = width * EXPANSION
        layers.append(blocks)
    params["layers"] = layers
    params["fc_w"] = jax.random.normal(nk(), (num_classes, 512 * EXPANSION),
                                       jnp.float32) / (2048.0 ** 0.5)
    params["fc_b"] = jnp.zeros((num_classes,), jnp.float32)
    return params


def _fold_bn_into_weight(w4, bn=None, bias=None):
    """Fold BN scale into the conv weight (per output channel); return f32 shift."""
    cout = w4.shape[0]
    if bn is not None:
        inv = 1.0 / jnp.sqrt(bn["var"] + BN_EPS)
        scale = bn["gamma"] * inv
        shift = bn["beta"] - bn["mean"] * scale
        w4 = w4 * scale[:, None, None, None]
    else:
        shift = jnp.zeros((cout,), jnp.float32) if bias is None else bias.astype(jnp.float32)
    return w4.astype(jnp.float32), shift.astype(jnp.float32)


def _prep_gemm(w4, bn=None, bias=None, *, cin_pad=None, k_round=1):
    """Conv/FC weight -> (Kp, Np) bf16 matrix (BN folded) + f32 (1, Np) shift row."""
    w4, shift = _fold_bn_into_weight(w4, bn, bias)
    cout, cin, kh, kw = w4.shape
    cin_p = cin if cin_pad is None else cin_pad
    cout_p = _round_up(cout, LANE)
    w4 = jnp.pad(w4, ((0, cout_p - cout), (0, cin_p - cin), (0, 0), (0, 0)))
    k = kh * kw * cin_p
    kp = _round_up(k, k_round)
    wmat = jnp.transpose(w4, (2, 3, 1, 0)).reshape(k, cout_p)
    wmat = jnp.pad(wmat, ((0, kp - k), (0, 0))).astype(jnp.bfloat16)
    shift = jnp.pad(shift, (0, cout_p - cout)).reshape(1, cout_p)
    return {"wmat": wmat, "shift": shift}


def _prep_conv3x3(w4, bn, *, cin_pad):
    """3x3 conv weight -> (9, Cin_p, Cout_p) bf16 taps (BN folded) + shift row."""
    w4, shift = _fold_bn_into_weight(w4, bn, None)
    cout, cin, kh, kw = w4.shape
    assert (kh, kw) == (3, 3)
    cout_p = _round_up(cout, LANE)
    w4 = jnp.pad(w4, ((0, cout_p - cout), (0, cin_pad - cin), (0, 0), (0, 0)))
    w9 = jnp.transpose(w4, (2, 3, 1, 0)).reshape(9, cin_pad, cout_p).astype(jnp.bfloat16)
    shift = jnp.pad(shift, (0, cout_p - cout)).reshape(1, cout_p)
    return {"w9": w9, "shift": shift}


def prepare_inference_params(params, num_classes):
    fast = {"conv1": _prep_gemm(params["conv1"], params["bn1"], k_round=LANE),
            "layers": []}
    in_c = 64
    for (width, n_blocks, stride), blocks in zip(LAYER_CFG, params["layers"]):
        fblocks = []
        for b, blk in enumerate(blocks):
            s = stride if b == 0 else 1
            in_p = _round_up(in_c, LANE)
            width_p = _round_up(width, LANE)
            fb = {"conv1": _prep_gemm(blk["conv1"], blk["bn1"], cin_pad=in_p)}
            if s == 1:
                fb["conv2"] = _prep_conv3x3(blk["conv2"], blk["bn2"], cin_pad=width_p)
            else:
                fb["conv2"] = _prep_gemm(blk["conv2"], blk["bn2"], cin_pad=width_p)
            fb["conv3"] = _prep_gemm(blk["conv3"], blk["bn3"], cin_pad=width_p)
            if "ds_conv" in blk:
                fb["ds"] = _prep_gemm(blk["ds_conv"], blk["ds_bn"], cin_pad=in_p)
            fblocks.append(fb)
            in_c = width * EXPANSION
        fast["layers"].append(fblocks)
    w4 = params["fc_w"].reshape(num_classes, 512 * EXPANSION, 1, 1)
    fast["fc"] = _prep_gemm(w4, bn=None, bias=params["fc_b"], cin_pad=512 * EXPANSION)
    return fast


# ----------------------- ResNet-50 forward -----------------------
def resnet50_forward(fast, x_nchw, num_classes):
    x = jnp.transpose(x_nchw, (0, 2, 3, 1)).astype(jnp.bfloat16)   # NCHW -> NHWC
    x = conv_gemm_bn_act(x, fast["conv1"], kh=7, kw=7, stride=2, pad=3, relu=True)
    x = max_pool_3x3_s2(x)

    for (width, n_blocks, stride), blocks in zip(LAYER_CFG, fast["layers"]):
        for b, blk in enumerate(blocks):
            s = stride if b == 0 else 1
            identity = x
            out = conv_gemm_bn_act(x, blk["conv1"], kh=1, kw=1, stride=1, pad=0,
                                   relu=True)
            if s == 1:
                out = conv3x3_s1_bn_act(out, blk["conv2"], relu=True)
            else:
                out = conv_gemm_bn_act(out, blk["conv2"], kh=3, kw=3, stride=s,
                                       pad=1, relu=True)
            if "ds" in blk:
                identity = conv_gemm_bn_act(x, blk["ds"], kh=1, kw=1, stride=s,
                                            pad=0, relu=False)
            # conv3 + BN shift + residual add + ReLU fused in one GEMM epilogue.
            x = conv_gemm_bn_act(out, blk["conv3"], kh=1, kw=1, stride=1, pad=0,
                                 relu=True, residual=identity)

    feat = jnp.mean(x.astype(jnp.float32), axis=(1, 2)).astype(jnp.bfloat16)  # (N, 2048)
    logits = gemm_bn_act(feat, fast["fc"], None, relu=False, out_dtype=jnp.float32)
    return logits[:, :num_classes]


if __name__ == "__main__":
    NUM_CLASSES = 10
    key = jax.random.PRNGKey(0)

    # --- numerical self-check of the im2col-free 3x3 kernel (riskiest new code) ---
    ck = jax.random.fold_in(key, 123)
    cin, cout, hh, ww = 64, 64, 8, 8
    xc = jax.random.normal(jax.random.fold_in(ck, 1), (2, hh, ww, 128), jnp.float32)
    xc = xc.at[..., cin:].set(0.0)           # padded channels are zero, as in the net
    wc = _conv_w(jax.random.fold_in(ck, 2), cout, cin, 3, 3)
    p3 = _prep_conv3x3(wc, _bn_p(cout), cin_pad=128)
    got = conv3x3_s1_bn_act(xc.astype(jnp.bfloat16), p3, relu=True).astype(jnp.float32)
    xr = xc.astype(jnp.bfloat16).astype(jnp.float32)
    w9f = p3["w9"].astype(jnp.float32)
    xpd = jnp.pad(xr, ((0, 0), (1, 1), (1, 1), (0, 0)))
    ref = sum(jnp.einsum("nhwc,cf->nhwf",
                         xpd[:, d // 3:d // 3 + hh, d % 3:d % 3 + ww, :], w9f[d])
              for d in range(9))
    ref = jnp.maximum(ref + p3["shift"].astype(jnp.float32).reshape(1, 1, 1, -1), 0.0)
    rel_err = jnp.max(jnp.abs(got - ref)) / (jnp.max(jnp.abs(ref)) + 1e-6)
    assert float(rel_err) < 3e-2, f"3x3 kernel mismatch: rel err {float(rel_err)}"

    # --- full ResNet-50 forward ---
    x = jax.random.normal(jax.random.fold_in(key, 999), (2, 3, 32, 32), jnp.float32)
    params = make_resnet50_params(key, NUM_CLASSES)
    fast = prepare_inference_params(params, NUM_CLASSES)
    fwd = jax.jit(functools.partial(resnet50_forward, num_classes=NUM_CLASSES))
    out = fwd(fast, x)
    out = jax.block_until_ready(out)
    assert out.shape == (2, NUM_CLASSES), out.shape
    assert bool(jnp.all(jnp.isfinite(out)))
    print("KERNEL_OK")
</pallas_src>

<mosaic_0001>
module attributes {stable_mosaic.version = 11 : i64} {
  func.func @_conv3x3_s1_kernel(%arg0: i32, %arg1: memref<1x110x128xbf16, #tpu.memory_space<vmem>>, %arg2: memref<9x128x128xbf16, #tpu.memory_space<vmem>>, %arg3: memref<1x128xf32, #tpu.memory_space<vmem>>, %arg4: memref<1x8x8x128xbf16, #tpu.memory_space<vmem>>) attributes {dimension_semantics = [#tpu.dimension_semantics<parallel>], iteration_bounds = array<i64: 2>, scalar_prefetch = 0 : i64, scratch_operands = 0 : i64, tpu.core_type = #tpu.core_type<tc>, window_params = [{transform_indices = @transform_0, window_bounds = array<i64: 1, 110, 128>}, {pipeline_mode = #tpu.pipeline_mode<synchronous>, transform_indices = @transform_1, window_bounds = array<i64: 9, 128, 128>}, {pipeline_mode = #tpu.pipeline_mode<synchronous>, transform_indices = @transform_2, window_bounds = array<i64: 1, 128>}, {transform_indices = @transform_3, window_bounds = array<i64: 1, 8, 8, 128>}]} {
    %c0 = arith.constant 0 : index
    %c0_0 = arith.constant 0 : index
    %c0_1 = arith.constant 0 : index
    %0 = vector.load %arg1[%c0, %c0_0, %c0_1] : memref<1x110x128xbf16, #tpu.memory_space<vmem>>, vector<1x80x128xbf16>
    %1 = vector.shape_cast %0 : vector<1x80x128xbf16> to vector<80x128xbf16>
    %c0_2 = arith.constant 0 : index
    %c0_3 = arith.constant 0 : index
    %c0_4 = arith.constant 0 : index
    %2 = vector.load %arg2[%c0_2, %c0_3, %c0_4] : memref<9x128x128xbf16, #tpu.memory_space<vmem>>, vector<1x128x128xbf16>
    %3 = vector.shape_cast %2 : vector<1x128x128xbf16> to vector<128x128xbf16>
    %cst = arith.constant dense<0.000000e+00> : vector<80x128xf32>
    %4 = tpu.matmul %1, %3, %cst {dimension_numbers = #tpu.dot_dimension_numbers<[1], [0], [0], [1], [0, 0, 1, 1], [], []>} : vector<80x128xbf16>, vector<128x128xbf16>, vector<80x128xf32> -> vector<80x128xf32>
    %c0_5 = arith.constant 0 : index
    %c1 = arith.constant 1 : index
    %c0_6 = arith.constant 0 : index
    %5 = vector.load %arg1[%c0_5, %c1, %c0_6] : memref<1x110x128xbf16, #tpu.memory_space<vmem>>, vector<1x80x128xbf16>
    %6 = vector.shape_cast %5 : vector<1x80x128xbf16> to vector<80x128xbf16>
    %c1_7 = arith.constant 1 : index
    %c0_8 = arith.constant 0 : index
    %c0_9 = arith.constant 0 : index
    %7 = vector.load %arg2[%c1_7, %c0_8, %c0_9] : memref<9x128x128xbf16, #tpu.memory_space<vmem>>, vector<1x128x128xbf16>
    %8 = vector.shape_cast %7 : vector<1x128x128xbf16> to vector<128x128xbf16>
    %cst_10 = arith.constant dense<0.000000e+00> : vector<80x128xf32>
    %9 = tpu.matmul %6, %8, %cst_10 {dimension_numbers = #tpu.dot_dimension_numbers<[1], [0], [0], [1], [0, 0, 1, 1], [], []>} : vector<80x128xbf16>, vector<128x128xbf16>, vector<80x128xf32> -> vector<80x128xf32>
    %10 = arith.addf %4, %9 : vector<80x128xf32>
    %c0_11 = arith.constant 0 : index
    %c2 = arith.constant 2 : index
    %c0_12 = arith.constant 0 : index
    %11 = vector.load %arg1[%c0_11, %c2, %c0_12] : memref<1x110x128xbf16, #tpu.memory_space<vmem>>, vector<1x80x128xbf16>
    %12 = vector.shape_cast %11 : vector<1x80x128xbf16> to vector<80x128xbf16>
    %c2_13 = arith.constant 2 : index
    %c0_14 = arith.constant 0 : index
    %c0_15 = arith.constant 0 : index
    %13 = vector.load %arg2[%c2_13, %c0_14, %c0_15] : memref<9x128x128xbf16, #tpu.memory_space<vmem>>, vector<1x128x128xbf16>
    %14 = vector.shape_cast %13 : vector<1x128x128xbf16> to vector<128x128xbf16>
    %cst_16 = arith.constant dense<0.000000e+00> : vector<80x128xf32>
    %15 = tpu.matmul %12, %14, %cst_16 {dimension_numbers = #tpu.dot_dimension_numbers<[1], [0], [0], [1], [0, 0, 1, 1], [], []>} : vector<80x128xbf16>, vector<128x128xbf16>, vector<80x128xf32> -> vector<80x128xf32>
    %16 = arith.addf %10, %15 : vector<80x128xf32>
    %c0_17 = arith.constant 0 : index
    %c10 = arith.constant 10 : index
    %c0_18 = arith.constant 0 : index
    %17 = vector.load %arg1[%c0_17, %c10, %c0_18] : memref<1x110x128xbf16, #tpu.memory_space<vmem>>, vector<1x80x128xbf16>
    %18 = vector.shape_cast %17 : vector<1x80x128xbf16> to vector<80x128xbf16>
    %c3 = arith.constant 3 : index
    %c0_19 = arith.constant 0 : index
    %c0_20 = arith.constant 0 : index
    %19 = vector.load %arg2[%c3, %c0_19, %c0_20] : memref<9x128x128xbf16, #tpu.memory_space<vmem>>, vector<1x128x128xbf16>
    %20 = vector.shape_cast %19 : vector<1x128x128xbf16> to vector<128x128xbf16>
    %cst_21 = arith.constant dense<0.000000e+00> : vector<80x128xf32>
    %21 = tpu.matmul %18, %20, %cst_21 {dimension_numbers = #tpu.dot_dimension_numbers<[1], [0], [0], [1], [0, 0, 1, 1], [], []>} : vector<80x128xbf16>, vector<128x128xbf16>, vector<80x128xf32> -> vector<80x128xf32>
    %22 = arith.addf %16, %21 : vector<80x128xf32>
    %c0_22 = arith.constant 0 : index
    %c11 = arith.constant 11 : index
    %c0_23 = arith.constant 0 : index
    %23 = vector.load %arg1[%c0_22, %c11, %c0_23] : memref<1x110x128xbf16, #tpu.memory_space<vmem>>, vector<1x80x128xbf16>
    %24 = vector.shape_cast %23 : vector<1x80x128xbf16> to vector<80x128xbf16>
    %c4 = arith.constant 4 : index
    %c0_24 = arith.constant 0 : index
    %c0_25 = arith.constant 0 : index
    %25 = vector.load %arg2[%c4, %c0_24, %c0_25] : memref<9x128x128xbf16, #tpu.memory_space<vmem>>, vector<1x128x128xbf16>
    %26 = vector.shape_cast %25 : vector<1x128x128xbf16> to vector<128x128xbf16>
    %cst_26 = arith.constant dense<0.000000e+00> : vector<80x128xf32>
    %27 = tpu.matmul %24, %26, %cst_26 {dimension_numbers = #tpu.dot_dimension_numbers<[1], [0], [0], [1], [0, 0, 1, 1], [], []>} : vector<80x128xbf16>, vector<128x128xbf16>, vector<80x128xf32> -> vector<80x128xf32>
    %28 = arith.addf %22, %27 : vector<80x128xf32>
    %c0_27 = arith.constant 0 : index
    %c12 = arith.constant 12 : index
    %c0_28 = arith.constant 0 : index
    %29 = vector.load %arg1[%c0_27, %c12, %c0_28] : memref<1x110x128xbf16, #tpu.memory_space<vmem>>, vector<1x80x128xbf16>
    %30 = vector.shape_cast %29 : vector<1x80x128xbf16> to vector<80x128xbf16>
    %c5 = arith.constant 5 : index
    %c0_29 = arith.constant 0 : index
    %c0_30 = arith.constant 0 : index
    %31 = vector.load %arg2[%c5, %c0_29, %c0_30] : memref<9x128x128xbf16, #tpu.memory_space<vmem>>, vector<1x128x128xbf16>
    %32 = vector.shape_cast %31 : vector<1x128x128xbf16> to vector<128x128xbf16>
    %cst_31 = arith.constant dense<0.000000e+00> : vector<80x128xf32>
    %33 = tpu.matmul %30, %32, %cst_31 {dimension_numbers = #tpu.dot_dimension_numbers<[1], [0], [0], [1], [0, 0, 1, 1], [], []>} : vector<80x128xbf16>, vector<128x128xbf16>, vector<80x128xf32> -> vector<80x128xf32>
    %34 = arith.addf %28, %33 : vector<80x128xf32>
    %c0_32 = arith.constant 0 : index
    %c20 = arith.constant 20 : index
    %c0_33 = arith.constant 0 : index
    %35 = vector.load %arg1[%c0_32, %c20, %c0_33] : memref<1x110x128xbf16, #tpu.memory_space<vmem>>, vector<1x80x128xbf16>
    %36 = vector.shape_cast %35 : vector<1x80x128xbf16> to vector<80x128xbf16>
    %c6 = arith.constant 6 : index
    %c0_34 = arith.constant 0 : index
    %c0_35 = arith.constant 0 : index
    %37 = vector.load %arg2[%c6, %c0_34, %c0_35] : memref<9x128x128xbf16, #tpu.memory_space<vmem>>, vector<1x128x128xbf16>
    %38 = vector.shape_cast %37 : vector<1x128x128xbf16> to vector<128x128xbf16>
    %cst_36 = arith.constant dense<0.000000e+00> : vector<80x128xf32>
    %39 = tpu.matmul %36, %38, %cst_36 {dimension_numbers = #tpu.dot_dimension_numbers<[1], [0], [0], [1], [0, 0, 1, 1], [], []>} : vector<80x128xbf16>, vector<128x128xbf16>, vector<80x128xf32> -> vector<80x128xf32>
    %40 = arith.addf %34, %39 : vector<80x128xf32>
    %c0_37 = arith.constant 0 : index
    %c21 = arith.constant 21 : index
    %c0_38 = arith.constant 0 : index
    %41 = vector.load %arg1[%c0_37, %c21, %c0_38] : memref<1x110x128xbf16, #tpu.memory_space<vmem>>, vector<1x80x128xbf16>
    %42 = vector.shape_cast %41 : vector<1x80x128xbf16> to vector<80x128xbf16>
    %c7 = arith.constant 7 : index
    %c0_39 = arith.constant 0 : index
    %c0_40 = arith.constant 0 : index
    %43 = vector.load %arg2[%c7, %c0_39, %c0_40] : memref<9x128x128xbf16, #tpu.memory_space<vmem>>, vector<1x128x128xbf16>
    %44 = vector.shape_cast %43 : vector<1x128x128xbf16> to vector<128x128xbf16>
    %cst_41 = arith.constant dense<0.000000e+00> : vector<80x128xf32>
    %45 = tpu.matmul %42, %44, %cst_41 {dimension_numbers = #tpu.dot_dimension_numbers<[1], [0], [0], [1], [0, 0, 1, 1], [], []>} : vector<80x128xbf16>, vector<128x128xbf16>, vector<80x128xf32> -> vector<80x128xf32>
    %46 = arith.addf %40, %45 : vector<80x128xf32>
    %c0_42 = arith.constant 0 : index
    %c22 = arith.constant 22 : index
    %c0_43 = arith.constant 0 : index
    %47 = vector.load %arg1[%c0_42, %c22, %c0_43] : memref<1x110x128xbf16, #tpu.memory_space<vmem>>, vector<1x80x128xbf16>
    %48 = vector.shape_cast %47 : vector<1x80x128xbf16> to vector<80x128xbf16>
    %c8 = arith.constant 8 : index
    %c0_44 = arith.constant 0 : index
    %c0_45 = arith.constant 0 : index
    %49 = vector.load %arg2[%c8, %c0_44, %c0_45] : memref<9x128x128xbf16, #tpu.memory_space<vmem>>, vector<1x128x128xbf16>
    %50 = vector.shape_cast %49 : vector<1x128x128xbf16> to vector<128x128xbf16>
    %cst_46 = arith.constant dense<0.000000e+00> : vector<80x128xf32>
    %51 = tpu.matmul %48, %50, %cst_46 {dimension_numbers = #tpu.dot_dimension_numbers<[1], [0], [0], [1], [0, 0, 1, 1], [], []>} : vector<80x128xbf16>, vector<128x128xbf16>, vector<80x128xf32> -> vector<80x128xf32>
    %52 = arith.addf %46, %51 : vector<80x128xf32>
    %c0_47 = arith.constant 0 : index
    %c0_48 = arith.constant 0 : index
    %53 = vector.load %arg3[%c0_47, %c0_48] : memref<1x128xf32, #tpu.memory_space<vmem>>, vector<1x128xf32>
    %54 = vector.broadcast %53 : vector<1x128xf32> to vector<80x128xf32>
    %55 = arith.addf %52, %54 : vector<80x128xf32>
    %cst_49 = arith.constant 0.000000e+00 : f32
    %56 = vector.broadcast %cst_49 : f32 to vector<80x128xf32>
    %57 = arith.maximumf %55, %56 : vector<80x128xf32>
    %58 = arith.truncf %57 : vector<80x128xf32> to vector<80x128xbf16>
    %59 = vector.extract_strided_slice %58 {offsets = [0, 0], sizes = [8, 128], strides = [1, 1]} : vector<80x128xbf16> to vector<8x128xbf16>
    %c0_50 = arith.constant 0 : index
    %c0_51 = arith.constant 0 : index
    %c0_52 = arith.constant 0 : index
    %c0_53 = arith.constant 0 : index
    %60 = vector.load %arg4[%c0_50, %c0_51, %c0_52, %c0_53] : memref<1x8x8x128xbf16, #tpu.memory_space<vmem>>, vector<1x1x8x128xbf16>
    %61 = vector.shape_cast %60 : vector<1x1x8x128xbf16> to vector<8x128xbf16>
    %62 = vector.shape_cast %59 : vector<8x128xbf16> to vector<1x1x8x128xbf16>
    tpu.vector_store %arg4[%c0_50, %c0_51, %c0_52, %c0_53], %62 {strides = array<i32>} : memref<1x8x8x128xbf16, #tpu.memory_space<vmem>>, vector<1x1x8x128xbf16>,
    %63 = vector.extract_strided_slice %58 {offsets = [10, 0], sizes = [8, 128], strides = [1, 1]} : vector<80x128xbf16> to vector<8x128xbf16>
    %c0_54 = arith.constant 0 : index
    %c1_55 = arith.constant 1 : index
    %c0_56 = arith.constant 0 : index
    %c0_57 = arith.constant 0 : index
    %64 = vector.load %arg4[%c0_54, %c1_55, %c0_56, %c0_57] : memref<1x8x8x128xbf16, #tpu.memory_space<vmem>>, vector<1x1x8x128xbf16>
    %65 = vector.shape_cast %64 : vector<1x1x8x128xbf16> to vector<8x128xbf16>
    %66 = vector.shape_cast %63 : vector<8x128xbf16> to vector<1x1x8x128xbf16>
    tpu.vector_store %arg4[%c0_54, %c1_55, %c0_56, %c0_57], %66 {strides = array<i32>} : memref<1x8x8x128xbf16, #tpu.memory_space<vmem>>, vector<1x1x8x128xbf16>,
    %67 = vector.extract_strided_slice %58 {offsets = [20, 0], sizes = [8, 128], strides = [1, 1]} : vector<80x128xbf16> to vector<8x128xbf16>
    %c0_58 = arith.constant 0 : index
    %c2_59 = arith.constant 2 : index
    %c0_60 = arith.constant 0 : index
    %c0_61 = arith.constant 0 : index
    %68 = vector.load %arg4[%c0_58, %c2_59, %c0_60, %c0_61] : memref<1x8x8x128xbf16, #tpu.memory_space<vmem>>, vector<1x1x8x128xbf16>
    %69 = vector.shape_cast %68 : vector<1x1x8x128xbf16> to vector<8x128xbf16>
    %70 = vector.shape_cast %67 : vector<8x128xbf16> to vector<1x1x8x128xbf16>
    tpu.vector_store %arg4[%c0_58, %c2_59, %c0_60, %c0_61], %70 {strides = array<i32>} : memref<1x8x8x128xbf16, #tpu.memory_space<vmem>>, vector<1x1x8x128xbf16>,
    %71 = vector.extract_strided_slice %58 {offsets = [30, 0], sizes = [8, 128], strides = [1, 1]} : vector<80x128xbf16> to vector<8x128xbf16>
    %c0_62 = arith.constant 0 : index
    %c3_63 = arith.constant 3 : index
    %c0_64 = arith.constant 0 : index
    %c0_65 = arith.constant 0 : index
    %72 = vector.load %arg4[%c0_62, %c3_63, %c0_64, %c0_65] : memref<1x8x8x128xbf16, #tpu.memory_space<vmem>>, vector<1x1x8x128xbf16>
    %73 = vector.shape_cast %72 : vector<1x1x8x128xbf16> to vector<8x128xbf16>
    %74 = vector.shape_cast %71 : vector<8x128xbf16> to vector<1x1x8x128xbf16>
    tpu.vector_store %arg4[%c0_62, %c3_63, %c0_64, %c0_65], %74 {strides = array<i32>} : memref<1x8x8x128xbf16, #tpu.memory_space<vmem>>, vector<1x1x8x128xbf16>,
    %75 = vector.extract_strided_slice %58 {offsets = [40, 0], sizes = [8, 128], strides = [1, 1]} : vector<80x128xbf16> to vector<8x128xbf16>
    %c0_66 = arith.constant 0 : index
    %c4_67 = arith.constant 4 : index
    %c0_68 = arith.constant 0 : index
    %c0_69 = arith.constant 0 : index
    %76 = vector.load %arg4[%c0_66, %c4_67, %c0_68, %c0_69] : memref<1x8x8x128xbf16, #tpu.memory_space<vmem>>, vector<1x1x8x128xbf16>
    %77 = vector.shape_cast %76 : vector<1x1x8x128xbf16> to vector<8x128xbf16>
    %78 = vector.shape_cast %75 : vector<8x128xbf16> to vector<1x1x8x128xbf16>
    tpu.vector_store %arg4[%c0_66, %c4_67, %c0_68, %c0_69], %78 {strides = array<i32>} : memref<1x8x8x128xbf16, #tpu.memory_space<vmem>>, vector<1x1x8x128xbf16>,
    %79 = vector.extract_strided_slice %58 {offsets = [50, 0], sizes = [8, 128], strides = [1, 1]} : vector<80x128xbf16> to vector<8x128xbf16>
    %c0_70 = arith.constant 0 : index
    %c5_71 = arith.constant 5 : index
    %c0_72 = arith.constant 0 : index
    %c0_73 = arith.constant 0 : index
    %80 = vector.load %arg4[%c0_70, %c5_71, %c0_72, %c0_73] : memref<1x8x8x128xbf16, #tpu.memory_space<vmem>>, vector<1x1x8x128xbf16>
    %81 = vector.shape_cast %80 : vector<1x1x8x128xbf16> to vector<8x128xbf16>
    %82 = vector.shape_cast %79 : vector<8x128xbf16> to vector<1x1x8x128xbf16>
    tpu.vector_store %arg4[%c0_70, %c5_71, %c0_72, %c0_73], %82 {strides = array<i32>} : memref<1x8x8x128xbf16, #tpu.memory_space<vmem>>, vector<1x1x8x128xbf16>,
    %83 = vector.extract_strided_slice %58 {offsets = [60, 0], sizes = [8, 128], strides = [1, 1]} : vector<80x128xbf16> to vector<8x128xbf16>
    %c0_74 = arith.constant 0 : index
    %c6_75 = arith.constant 6 : index
    %c0_76 = arith.constant 0 : index
    %c0_77 = arith.constant 0 : index
    %84 = vector.load %arg4[%c0_74, %c6_75, %c0_76, %c0_77] : memref<1x8x8x128xbf16, #tpu.memory_space<vmem>>, vector<1x1x8x128xbf16>
    %85 = vector.shape_cast %84 : vector<1x1x8x128xbf16> to vector<8x128xbf16>
    %86 = vector.shape_cast %83 : vector<8x128xbf16> to vector<1x1x8x128xbf16>
    tpu.vector_store %arg4[%c0_74, %c6_75, %c0_76, %c0_77], %86 {strides = array<i32>} : memref<1x8x8x128xbf16, #tpu.memory_space<vmem>>, vector<1x1x8x128xbf16>,
    %87 = vector.extract_strided_slice %58 {offsets = [70, 0], sizes = [8, 128], strides = [1, 1]} : vector<80x128xbf16> to vector<8x128xbf16>
    %c0_78 = arith.constant 0 : index
    %c7_79 = arith.constant 7 : index
    %c0_80 = arith.constant 0 : index
    %c0_81 = arith.constant 0 : index
    %88 = vector.load %arg4[%c0_78, %c7_79, %c0_80, %c0_81] : memref<1x8x8x128xbf16, #tpu.memory_space<vmem>>, vector<1x1x8x128xbf16>
    %89 = vector.shape_cast %88 : vector<1x1x8x128xbf16> to vector<8x128xbf16>
    %90 = vector.shape_cast %87 : vector<8x128xbf16> to vector<1x1x8x128xbf16>
    tpu.vector_store %arg4[%c0_78, %c7_79, %c0_80, %c0_81], %90 {strides = array<i32>} : memref<1x8x8x128xbf16, #tpu.memory_space<vmem>>, vector<1x1x8x128xbf16>,
    return
  }
  func.func @transform_0(%arg0: i32) -> (i32, i32, i32) {
    %c0_i32 = arith.constant 0 : i32
    %c0_i32_0 = arith.constant 0 : i32
    %c0_i32_1 = arith.constant 0 : i32
    return %arg0, %c0_i32, %c0_i32_0 : i32, i32, i32
  }
  func.func @transform_1(%arg0: i32) -> (i32, i32, i32) {
    %c0_i32 = arith.constant 0 : i32
    %c0_i32_0 = arith.constant 0 : i32
    %c0_i32_1 = arith.constant 0 : i32
    %c0_i32_2 = arith.constant 0 : i32
    return %c0_i32, %c0_i32_0, %c0_i32_1 : i32, i32, i32
  }
  func.func @transform_2(%arg0: i32) -> (i32, i32) {
    %c0_i32 = arith.constant 0 : i32
    %c0_i32_0 = arith.constant 0 : i32
    %c0_i32_1 = arith.constant 0 : i32
    return %c0_i32, %c0_i32_0 : i32, i32
  }
  func.func @transform_3(%arg0: i32) -> (i32, i32, i32, i32) {
    %c0_i32 = arith.constant 0 : i32
    %c0_i32_0 = arith.constant 0 : i32
    %c0_i32_1 = arith.constant 0 : i32
    %c0_i32_2 = arith.constant 0 : i32
    return %arg0, %c0_i32, %c0_i32_0, %c0_i32_1 : i32, i32, i32, i32
  }
}

</mosaic_0001>

<bundles_post_ra>
// kernel: tpu_custom_call.1
= control target key start
LH: loop header
LB: loop body
LE: loop exit
PB: predicated region body
PF: predicated region fallthrough
CT: control target
= control target key end

     0   :  { %8 = vsyncpa [#allocation3], 0  ;;  %s3504_s0 = inlined_call_operand.vmem [shape: bf16[2,110,128], index: 0, kind: input, shape index: {}]   ;;  %s3505_s1 = inlined_call_operand.hbm [shape: bf16[9,128,128], index: 1, kind: input, shape index: {}]   ;;  %s3506_s2 = inlined_call_operand.vmem [shape: f32[1,128], index: 2, kind: input, shape index: {}]   ;;  %s3507_s3 = inlined_call_operand.hbm [shape: bf16[2,8,8,128], index: 3, kind: output, shape index: {}]  }
   0x1   :  { %9 = vsyncpa [#allocation4], 0 }
   0x2   :  { %11 = vsyncpa [#allocation4 + $0x1], 0  ;;  %s2961_s12 = smov 0   ;;  %s2963_s13 = smov 0  }
   0x3   :  { %s2965_s14 = smov 0   ;;  %s2967_s15 = smov 0  }
   0x4 LB: > { %s2982_s16 = sadd.s32 4294967295, %s2931_s15   ;;  %s2087_s17 = sadd.s32 4294967294, %s2931_s15   ;;  %s2931_s15 = sphi %s2967_s15, %s3529_s15   ;;  %s2927_s14 = sphi %s2965_s14, %s3528_s14   ;;  %s2923_s13 = sphi %s2963_s13, %s3527_s13   ;;  %s2919_s12 = sphi %s2961_s12, %s3526_s12  }
   0x5   : > { %s2986_s18 = sadd.s32 1, %s2931_s15   ;;  %s92_s19 = sadd.s32 1, %s2927_s14 }
   0x6   : > { %s89_s20 = ssub.s32 %s2931_s15, %s2986_s18  ;;  %p102_p0 = scmp.ne.s32.totalorder %s2927_s14, %s2923_s13 }
   0x7   : > { %p90_p1 = scmp.eq.s32.totalorder %s89_s20, 0  ;;  %p103_p2 = scmp.eq.s32.totalorder %s2982_s16, 1 }
   0x8   : > { %p108_p3 = scmp.ne.s32.totalorder %s2923_s13, %s2919_s12  ;;  %p109_p4 = scmp.eq.s32.totalorder %s2087_s17, 1 }
   0x9   : > { %s2997_s21 = scalar_select %p90_p1, %s2927_s14, %s92_s19  }
   0xa   : > { %p2999_p5 = por %p103_p2, %p102_p0  ;;  %p3003_p6 = por %p109_p4, %p108_p3 }
   0xb   : > { %p2088_p7 = scmp.ge.s32.totalorder %s2931_s15, 1  ;;  %p116_p8 = scmp.lt.s32.totalorder %s2931_s15, 3 }
   0xc   : > { %s3511_s22 = scalar_select %p2999_p5, 1, 0 }
   0xd   : > { %s3512_s23 = scalar_select %p3003_p6, 1, 0 }
   0xe   : > { %p3508_p9 = scmp.eq.s32.totalorder %s2982_s16, 0  ;;  %p3010_p10 = pnand %p2088_p7, %p116_p8 }
   0xf   : > { %s2933_s25 = smov [#allocation2]   ;;  %s2837_s30 = scalar_lea.hbm %s3505_s1, 9216 }
  0x10   : > { %s3513_s24 = scalar_select %p3010_p10, 1, 0 }
  0x11   : > { %s128_s26 = sshll.u32 %s2933_s25, 4  ;;  %p2692_p11 = pneg %p3010_p10  ;;  %s129_s26 = int_to_ptr.vmem [resolvable:$true] %s128_s26 }
  0x12   : > { %p2838_p13 = scmp.ne.s32.totalorder %s3505_s1, %s2837_s30  ;;  %p2844_p3 = scmp.lt.u32.totalorder %s2837_s30, %s3505_s1 }
  0x13   : > { %p3018_p12 = pnand %p3508_p9, %p2692_p11 }
  0x15   : > { %p2839_p0 = pneg %p3018_p12 }
  0x17   : > { %p2840_p1 = pnand %p2839_p0, %p2838_p13 }
  0x19   : > { %p2841_p2 = pneg %p2840_p1 }
  0x1b   : > { %p2846_p4 = pnand %p2844_p3, %p2841_p2 }
  0x1d   : > { %2849 = shalt.err (!%p2846_p4)
}
  0x1e   : > { %s2850_s8 = scalar_lea.vmem %s129_s26, 9216  ;;  %p2858_p9 = scmp.lt.s32.totalorder %s129_s26, %s129_s26 }
  0x1f   : > { %p2851_p7 = scmp.ne.s32.totalorder %s129_s26, %s2850_s8  ;;  %p2859_p6 = scmp.lt.s32.totalorder %s2850_s8, %s2850_s8 }
  0x21   : > { %p2853_p8 = pnand %p2851_p7, %p2839_p0  ;;  %p2860_p5 = por %p2859_p6, %p2858_p9 }
  0x23   : > { %p2854_p11 = pneg %p2853_p8 }
  0x25   : > { %p2861_p10 = pnand %p2860_p5, %p2854_p11 }
  0x27   : > { %2864 = shalt.err (!%p2861_p10)
}
  0x28   : > { %s2934_s9 = smov 64   ;;  %s2935_s10 = smov 4  }
  0x29   : > { %2695 = dma.hbm_to_vmem [thread:$0]  (!%p3018_p12), %s3505_s1, 9216, %s129_s26, [#allocation3], %s2934_s9, %s2934_s9, %s2935_s10  }
  0x2a   : > { %p3515_p13 = scmp.ne.s32.totalorder %s3513_s24, 0 }
  0x2b   : > { %p3516_p1 = scmp.eq.s32.totalorder (!%p3515_p13), %s2982_s16, 0 }
  0x2c   : > { %155 = sbr.rel (%p3515_p13) target bundleno = 500 (0x1f4), region = 32 }
  0x33   : > { %2910 = dma.done.wait (%p3516_p1), [#allocation3], 9216   ;;  %p3517_p0 = pmov %p3516_p1 }
  0x34   : > { %v2936_v0 = vmov 0.0   ;;  %vm2937_vm0 = vmmov 0   ;;  %v2742_v1 = vld [vmem:[#allocation2 + $0x40] sm:$0xff]   ;;  %p179_p5 = scmp.lt.s32.totalorder %s2982_s16, 1  ;;  %v2744_v3 = vld [vmem:[#allocation2 + $0x48] sm:$0xff]   ;;  %v2746_v5 = vld [vmem:[#allocation2 + $0x50] sm:$0xff]  }
  0x35   : > { %2912 = vsyncadd (%p3517_p0), [#allocation3], 4294958080  ;;  %2345 = vmatprep.subr.bf16.mxu0 %v2936_v0  ;;  %2381 = vmatprep.subr.bf16.mxu1 %v2936_v0  ;;  %v2743_v2 = vld [vmem:[#allocation2] sm:$0xff]   ;;  %v2745_v4 = vld [vmem:[#allocation2 + $0x8] sm:$0xff]   ;;  %vm257_vm1 = vsmask.f32 7424 }
  0x36   : > { %2361 = vmatprep.mubr.msk.bf16.mxu0 %vm2937_vm0, %v2936_v0  ;;  %2397 = vmatprep.mubr.msk.bf16.mxu1 %vm2937_vm0, %v2936_v0  ;;  %s180_s19 = scalar_select %p179_p5, %s2982_s16, 1  ;;  %v2747_v6 = vld [vmem:[#allocation2 + $0x10] sm:$0xff]   ;;  %v2748_v7 = vld [vmem:[#allocation2 + $0x58] sm:$0xff]   ;;  %v2750_v9 = vld [vmem:[#allocation2 + $0x60] sm:$0xff]   ;;  %vm575_vm2 = vcmask 1046528   ;;  %vm1158_vm4 = vcmask 1045504  }
  0x37   : > { %2346 = vmatpush3.bf16.msra.mxu0 %v2742_v1  ;;  %2382 = vmatpush3.bf16.msra.mxu1 %v2743_v2  ;;  %v2749_v8 = vld [vmem:[#allocation2 + $0x18] sm:$0xff]   ;;  %v2751_v10 = vld [vmem:[#allocation2 + $0x20] sm:$0xff]   ;;  %v2752_v13 = vld [vmem:[#allocation2 + $0x68] sm:$0xff]   ;;  %vm947_vm3 = vsmask.f32 6400  ;;  %vm1741_vm6 = vcmask 1044480  }
  0x38   : > { %2347 = vmatprep.subr.bf16.mxu0 %v2936_v0  ;;  %2383 = vmatprep.subr.bf16.mxu1 %v2936_v0  ;;  %s2685_s20 = smul.u32 56, %s180_s19  ;;  %v2753_v16 = vld [vmem:[#allocation2 + $0x28] sm:$0xff]   ;;  %v2754_v18 = vld [vmem:[#allocation2 + $0x70] sm:$0xff]   ;;  %v2756_v23 = vld [vmem:[#allocation2 + $0x78] sm:$0xff]   ;;  %vm1530_vm5 = vsmask.f32 5376 }
  0x39   : > { %v2755_v22 = vld [vmem:[#allocation2 + $0x30] sm:$0xff]   ;;  %v2757_v27 = vld [vmem:[#allocation2 + $0x38] sm:$0xff]   ;;  %v2760_v28 = vld [vmem:[#allocation2 + $0x80] sm:$0xff]   ;;  %s176_s29 = sand.u32 1, %s2923_s13   ;;  %vm1928_vm7 = vcmask 1042432   ;;  %vm1929_vm8 = vcmask 1046532  }
  0x3a   : > { %s3061_s26 = scalar_lea.vmem %s3504_s0, %s2685_s20  ;;  %v2762_v32 = vld [vmem:[#allocation2 + $0xc0] sm:$0xff]   ;;  %v2761_v34 = vld [vmem:[#allocation2 + $0x88] sm:$0xff]   ;;  %v2764_v40 = vld [vmem:[#allocation2 + $0x90] sm:$0xff]   ;;  %s2093_s30 = sshll.u32 %s176_s29, 5  ;;  %vm1940_vm10 = vcmask 1041408   ;;  %vm1941_vm11 = vcmask 1045508  }
  0x3b   : > { %2348 = vmatpush3.bf16.msra.mxu0 %v2744_v3  ;;  %2384 = vmatpush3.bf16.msra.mxu1 %v2745_v4  ;;  %v185_v11 = vld [vmem:[%s3061_s26] sm:$0xf]  ;;  %v3067_v12 = vld [vmem:[%s3061_s26 + $0x4] sm:$0xf]  ;;  %v3071_v15 = vld [vmem:[%s3061_s26 + $0x8] sm:$0xff]   ;;  %s3406_s4 = scalar_lea.vmem [#allocation5], %s2093_s30 }
  0x3c   : > { %2349 = vmatprep.subr.bf16.mxu0 %v2936_v0  ;;  %2385 = vmatprep.subr.bf16.mxu1 %v2936_v0  ;;  %v2095_v14 = vcombine.low %v185_v11, %v3067_v12  ;;  %v266_v21 = vshll.u32 %v3071_v15, 16  ;;  %v3079_v26 = vld [vmem:[%s3061_s26 + $0x10] sm:$0xff]   ;;  %v270_v30 = vshrl.u32 %v3071_v15, 16  ;;  %v3089_v33 = vld [vmem:[%s3061_s26 + $0x18] sm:$0xff]   ;;  %v2768_v42 = vld [vmem:[#allocation2 + $0xd0] sm:$0xff]   ;;  %vm1953_vm12 = vcmask 1040384  }
  0x3d   : > { %v274_v31 = vshll.u32 %v3079_v26, 16  ;;  %v2765_v37 = vld [vmem:[#allocation2 + $0xc8] sm:$0xff]   ;;  %v282_v38 = vshll.u32 %v3089_v33, 16  ;;  %v278_v41 = vshrl.u32 %v3079_v26, 16  ;;  %v2767_v44 = vld [vmem:[#allocation2 + $0x98] sm:$0xff]   ;;  %v3103_v45 = vld [vmem:[%s3061_s26 + $0x20] sm:$0xff]  }
  0x3e   : > { %v261_v17 = vshll.u32 %v2095_v14, 16  ;;  %v259_v19 = vshrl.u32 %v2095_v14, 16  ;;  %v268_v25 = vrot.slane %v266_v21, 1  ;;  %v2770_v47 = vld [vmem:[#allocation2 + $0xd8] sm:$0xff]   ;;  %v2769_v48 = vld [vmem:[#allocation2 + $0xa0] sm:$0xff]   ;;  %v286_v50 = vshrl.u32 %v3089_v33, 16  ;;  %vm3409_vm9 = vmor %vm1928_vm7, %vm1929_vm8 }
  0x3f   : > { %2350 = vmatpush3.bf16.msra.mxu0 %v2746_v5  ;;  %2386 = vmatpush3.bf16.msra.mxu1 %v2747_v6  ;;  %v276_v36 = vrot.slane %v274_v31, 1  ;;  %v284_v43 = vrot.slane %v282_v38, 1  ;;  %v290_v51 = vshll.u32 %v3103_v45, 16  ;;  %v2772_v52 = vld [vmem:[#allocation2 + $0xe0] sm:$0xff]   ;;  %v2773_v56 = vld [vmem:[#allocation2 + $0xa8] sm:$0xff]   ;;  %v294_v59 = vshrl.u32 %v3103_v45, 16  ;;  %vm3422_vm14 = vmor %vm1940_vm10, %vm1941_vm11 }
  0x40   : > { %2351 = vmatprep.subr.bf16.mxu0 %v2936_v0  ;;  %2387 = vmatprep.subr.bf16.mxu1 %v2936_v0  ;;  %v263_v20 = vrot.slane %v261_v17, 1  ;;  %v272_v35 = vor.u32 %v270_v30, %v268_v25  ;;  %v3117_v53 = vld [vmem:[%s3061_s26 + $0x28] ss:$0 sps:$4 sm:$0x11]   ;;  %v2774_v57 = vld [vmem:[#allocation2 + $0xe8] sm:$0xff]   ;;  %v2775_v61 = vld [vmem:[#allocation2 + $0xb0] sm:$0xff]  }
  0x41   : > { %v280_v46 = vor.u32 %v278_v41, %v276_v36  ;;  %v288_v54 = vor.u32 %v286_v50, %v284_v43  ;;  %v292_v55 = vrot.slane %v290_v51, 1  ;;  %v298_v60 = vshll.u32 %v3117_v53, 16  ;;  %v2777_v62 = vld [vmem:[#allocation2 + $0xf0] sm:$0xff]   ;;  %v2778_v63 = vld [vmem:[#allocation2 + $0xb8] sm:$0xff]   ;;  %v2797_v41 = vld [vmem:[#allocation2 + $0x168] sm:$0xff]   ;;  %s2227_s5 = sshll.u32 %s2982_s16, 9 }
  0x42   : > { %v264_v24 = vor.u32 %v263_v20, %v259_v19  ;;  %v277_v39 = vsel %vm257_vm1, %v272_v35, %v276_v36  ;;  %v554_v1 = vld [vmem:[%s3061_s26] sm:$0xe]  ;;  %v2779_v4 = vld [vmem:[#allocation2 + $0xf8] sm:$0xff]   ;;  %v723_v5 = vld [vmem:[%s3061_s26 + $0x4] sm:$0xe]  ;;  %v579_v21 = vrot.slane %v3079_v26, 1  ;;  %s3453_s9 = scalar_lea.hbm %s3507_s3, %s2227_s5 }
  0x43   : > { %2352 = vmatpush3.bf16.msra.mxu0 %v2748_v7  ;;  %2388 = vmatpush3.bf16.msra.mxu1 %v2749_v8  ;;  %v285_v49 = vsel %vm257_vm1, %v280_v46, %v284_v43  ;;  %v293_v58 = vsel %vm257_vm1, %v288_v54, %v292_v55  ;;  %v296_v2 = vor.u32 %v294_v59, %v292_v55  ;;  %v300_v3 = vrot.slane %v298_v60, 1  ;;  %v3141_v6 = vld [vmem:[%s3061_s26 + $0x8] sm:$0xf]  ;;  %v2785_v20 = vld [vmem:[#allocation2 + $0x140] sm:$0xff]   ;;  %v2800_v46 = vld [vmem:[#allocation2 + $0x170] sm:$0xff]   ;;  %s2013_s6 = sshll.u32 %s3406_s4, 4  ;;  %s3455_s6 = int_to_ptr.vmem [resolvable:$true] %s2013_s6 }
  0x44   : > { %2353 = vmatprep.subr.bf16.mxu0 %v2936_v0  ;;  %2389 = vmatprep.subr.bf16.mxu1 %v2936_v0  ;;  %v269_v29 = vsel %vm257_vm1, %v264_v24, %v268_v25  ;;  %v2117_v8 = vcombine.low %v554_v1, %v3067_v12  ;;  %v577_v12 = vrot.slane %v3071_v15, 1  ;;  %v2787_v25 = vld [vmem:[#allocation2 + $0x110] sm:$0xff]   ;;  %v2790_v30 = vld [vmem:[#allocation2 + $0x118] sm:$0xff]   ;;  %v2792_v35 = vld [vmem:[#allocation2 + $0x120] sm:$0xff]   ;;  %v583_v38 = vrot.slane %v3103_v45, 1  ;;  %s3463_s16 = scalar_lea.sflag [#allocation4], %s176_s29 }
  0x45   : > { %v301_v7 = vsel %vm257_vm1, %v296_v2, %v300_v3  ;;  %v3194_v36 = vld [vmem:[%s3061_s26 + $0x24] sm:$0xff]   ;;  %vm1954_vm13 = vcmask 1044484   ;;  %s2865_s10 = scalar_lea.vmem %s3455_s6, 512  ;;  %p3524_p9 = scmp.ne.s32.totalorder %s3511_s22, 0 }
  0x46   : > { %v576_v11 = vrot.slane %v2117_v8, 1  ;;  %v580_v24 = vsel %vm575_vm2, %v577_v12, %v579_v21  ;;  %v2802_v54 = vld [vmem:[#allocation2 + $0x178] sm:$0xff]   ;;  %v1137_v55 = vld [vmem:[%s3061_s26 + $0x4] sm:$0xc]  ;;  %vm3431_vm15 = vmor %vm1953_vm12, %vm1954_vm13  ;;  %p2866_p6 = scmp.ne.s32.totalorder %s3455_s6, %s2865_s10  ;;  %s2938_s11 = smov [#allocation5]  }
  0x47   : > { %2354 = vmatpush3.bf16.msra.mxu0 %v2750_v9  ;;  %2390 = vmatpush3.bf16.msra.mxu1 %v2751_v10  ;;  %v3147_v9 = vcombine.low %v723_v5, %v3141_v6  ;;  %v3150_v10 = vld [vmem:[%s3061_s26 + $0xc] sm:$0xff]   ;;  %s2869_s17 = sshll.u32 %s2938_s11, 4  ;;  %s2870_s17 = int_to_ptr.vmem [resolvable:$false] %s2869_s17 }
  0x48   : > { %2355 = vmatprep.subr.bf16.mxu0 %v2936_v0  ;;  %2391 = vmatprep.subr.bf16.mxu1 %v2936_v0  ;;  %v578_v17 = vsel %vm575_vm2, %v576_v11, %v577_v12  ;;  %v957_v50 = vshrl.u32 %v3150_v10, 16  ;;  %v960_v51 = vshll.u32 %v3150_v10, 16  ;;  %v1160_v5 = vrot.slane %v3150_v10, 2  ;;  %v2806_v12 = vld [vmem:[#allocation2 + $0x1c0] sm:$0xff]   ;;  %p2867_p10 = pnand %p2866_p6, %p3524_p9  ;;  %s2871_s19 = scalar_lea.vmem %s2870_s17, 1024 }
  0x49   : > { %p2872_p2 = scmp.lt.s32.totalorder %s3455_s6, %s2870_s17  ;;  %p2873_p3 = scmp.lt.s32.totalorder %s2871_s19, %s2865_s10 }
  0x4a   : > { %v959_v59 = vrot.slane %v957_v50, 1  ;;  %v962_v60 = vrot.slane %v960_v51, 2  ;;  %v2816_v50 = vld [vmem:[#allocation2 + $0x1b0] sm:$0xff]   ;;  %v3279_v51 = vld [vmem:[%s3061_s26 + $0x10] sm:$0xff]   ;;  %p2868_p12 = pneg %p2867_p10 }
  0x4b   : > { %2356 = vmatpush3.bf16.msra.mxu0 %v2752_v13  ;;  %2392 = vmatpush3.bf16.msra.mxu1 %v2753_v16  ;;  %v779_v13 = vrot.slane %v3147_v9, 1  ;;  %v2783_v16 = vld [vmem:[#allocation2 + $0x100] sm:$0xff]   ;;  %p2874_p4 = por %p2873_p3, %p2872_p2 }
  0x4c   : > { %2357 = vmatprep.subr.bf16.mxu0 %v2936_v0  ;;  %2393 = vmatprep.subr.bf16.mxu1 %v2936_v0  ;;  %v963_v1 = vor.u32 %v962_v60, %v959_v59  ;;  %v1543_v59 = vshll.u32 %v3279_v51, 16  ;;  %v2820_v60 = vld [vmem:[#allocation2 + $0x1f8] sm:$0xff]  }
  0x4d   : > { %p2875_p7 = pnand %p2874_p4, %p2868_p12 }
  0x4f   : > { %2358 = vmatpush3.bf16.msra.mxu0 %v2754_v18  ;;  %2394 = vmatpush3.bf16.msra.mxu1 %v2755_v22  ;;  %v3164_v18 = vld [vmem:[%s3061_s26 + $0x14] sm:$0xff]  }
  0x50   : > { %2359 = vmatprep.subr.bf16.mxu0 %v2936_v0  ;;  %2395 = vmatprep.subr.bf16.mxu1 %v2936_v0  ;;  %v782_v22 = vrot.slane %v3164_v18, 1  ;;  %v966_v2 = vshrl.u32 %v3164_v18, 16  ;;  %v969_v3 = vshll.u32 %v3164_v18, 16 }
  0x52   : > { %v968_v8 = vrot.slane %v966_v2, 1 }
  0x53   : > { %2360 = vmatpush3.bf16.msra.mxu0 %v2756_v23  ;;  %2396 = vmatpush3.bf16.msra.mxu1 %v2757_v27  ;;  %v2788_v23 = vld [vmem:[#allocation2 + $0x148] sm:$0xff]  }
  0x54   : > { %2417 = vmatprep.subr.bf16.mxu0 %v2936_v0  ;;  %2453 = vmatprep.subr.bf16.mxu1 %v2936_v0  ;;  %v3179_v27 = vld [vmem:[%s3061_s26 + $0x1c] sm:$0xff]  }
  0x55   : > { %v784_v31 = vrot.slane %v3179_v27, 1 }
  0x56   : > { %2362 = vmatmul.mubr.bf16.vlgmr.msra.gmra.mrb[0].mxu0 %v269_v29  ;;  %2398 = vmatmul.mubr.bf16.vlgmr.msra.gmra.mrb[0].mxu1 %v2095_v14  ;;  %v780_v14 = vrot.slane %v3150_v10, 1  ;;  %v581_v29 = vrot.slane %v3089_v33, 1  ;;  %v1162_v10 = vrot.slane %v3164_v18, 2 }
  0x57   : > { %2418 = vmatpush3.bf16.msra.mxu0 %v2760_v28  ;;  %2365 = vmatprep.mubr.msk.bf16.mxu0 %vm2937_vm0, %v2936_v0  ;;  %v2791_v28 = vld [vmem:[#allocation2 + $0x150] sm:$0xff]  }
  0x58   : > { %2419 = vmatprep.subr.bf16.mxu0 %v2936_v0  ;;  %2401 = vmatprep.mubr.msk.bf16.mxu1 %vm2937_vm0, %v2936_v0  ;;  %v781_v19 = vsel %vm575_vm2, %v779_v13, %v780_v14  ;;  %v2805_v13 = vld [vmem:[#allocation2 + $0x188] sm:$0xff]  }
  0x59   : > { %2454 = vmatpush3.bf16.msra.mxu1 %v2762_v32  ;;  %v2793_v32 = vld [vmem:[#allocation2 + $0x158] sm:$0xff]  }
  0x5a   : > { %2455 = vmatprep.subr.bf16.mxu1 %v2936_v0 }
  0x5b   : > { %2420 = vmatpush3.bf16.msra.mxu0 %v2761_v34  ;;  %v582_v34 = vsel %vm575_vm2, %v579_v21, %v581_v29 }
  0x5c   : > { %2421 = vmatprep.subr.bf16.mxu0 %v2936_v0 }
  0x5d   : > { %2456 = vmatpush3.bf16.msra.mxu1 %v2765_v37  ;;  %v2795_v37 = vld [vmem:[#allocation2 + $0x160] sm:$0xff]  }
  0x5e   : > { %2366 = vmatmul.mubr.bf16.gmra.mrb[4].mxu0 %v277_v39  ;;  %2457 = vmatprep.subr.bf16.mxu1 %v2936_v0  ;;  %v2796_v39 = vld [vmem:[#allocation2 + $0x128] sm:$0xff]  }
  0x5f   : > { %2402 = vmatmul.mubr.bf16.gmra.mrb[4].mxu1 %v3071_v15  ;;  %2422 = vmatpush3.bf16.msra.mxu0 %v2764_v40  ;;  %v2784_v15 = vld [vmem:[#allocation2 + $0x108] sm:$0xff]   ;;  %v786_v40 = vrot.slane %v3194_v36, 1 }
  0x60   : > { %2369 = vmatprep.mubr.msk.bf16.mxu0 %vm2937_vm0, %v2936_v0  ;;  %2405 = vmatprep.mubr.msk.bf16.mxu1 %vm2937_vm0, %v2936_v0 }
  0x61   : > { %2423 = vmatprep.subr.bf16.mxu0 %v2936_v0  ;;  %2458 = vmatpush3.bf16.msra.mxu1 %v2768_v42  ;;  %v584_v42 = vsel %vm575_vm2, %v581_v29, %v583_v38  ;;  %v787_v43 = vsel %vm575_vm2, %v784_v31, %v786_v40  ;;  %v1164_v29 = vrot.slane %v3179_v27, 2 }
  0x62   : > { %2459 = vmatprep.subr.bf16.mxu1 %v2936_v0 }
  0x63   : > { %2424 = vmatpush3.bf16.msra.mxu0 %v2767_v44  ;;  %v2798_v44 = vld [vmem:[#allocation2 + $0x130] sm:$0xff]  }
  0x64   : > { %2425 = vmatprep.subr.bf16.mxu0 %v2936_v0 }
  0x65   : > { %2460 = vmatpush3.bf16.msra.mxu1 %v2770_v47  ;;  %v585_v47 = vrot.slane %v3117_v53, 1  ;;  %v2801_v53 = vld [vmem:[#allocation2 + $0x138] sm:$0xff]  }
  0x66   : > { %2370 = vmatmul.mubr.bf16.gmra.mrb[8].mxu0 %v285_v49  ;;  %2461 = vmatprep.subr.bf16.mxu1 %v2936_v0  ;;  %v952_v49 = vshll.u32 %v3147_v9, 16 }
  0x67   : > { %2406 = vmatmul.mubr.bf16.gmra.mrb[8].mxu1 %v3079_v26  ;;  %2426 = vmatpush3.bf16.msra.mxu0 %v2769_v48  ;;  %v783_v26 = vsel %vm575_vm2, %v780_v14, %v782_v22  ;;  %v949_v48 = vshrl.u32 %v3147_v9, 16  ;;  %v971_v9 = vrot.slane %v969_v3, 2  ;;  %v1545_v3 = vrot.slane %v1543_v59, 3 }
  0x68   : > { %2373 = vmatprep.mubr.msk.bf16.mxu0 %vm2937_vm0, %v2936_v0  ;;  %2409 = vmatprep.mubr.msk.bf16.mxu1 %vm2937_vm0, %v2936_v0 }
  0x69   : > { %2427 = vmatprep.subr.bf16.mxu0 %v2936_v0  ;;  %2462 = vmatpush3.bf16.msra.mxu1 %v2772_v52  ;;  %v972_v14 = vor.u32 %v971_v9, %v968_v8 }
  0x6a   : > { %2463 = vmatprep.subr.bf16.mxu1 %v2936_v0 }
  0x6b   : > { %2428 = vmatpush3.bf16.msra.mxu0 %v2773_v56  ;;  %v586_v56 = vsel %vm575_vm2, %v583_v38, %v585_v47 }
  0x6c   : > { %2429 = vmatprep.subr.bf16.mxu0 %v2936_v0 }
  0x6d   : > { %2464 = vmatpush3.bf16.msra.mxu1 %v2774_v57  ;;  %v951_v57 = vrot.slane %v949_v48, 1 }
  0x6e   : > { %2374 = vmatmul.mubr.bf16.gmra.mrb[12].mxu0 %v293_v58  ;;  %2465 = vmatprep.subr.bf16.mxu1 %v2936_v0  ;;  %v954_v58 = vrot.slane %v952_v49, 2 }
  0x6f   : > { %2410 = vmatmul.mubr.bf16.gmra.mrb[12].mxu1 %v3089_v33  ;;  %2377 = vmatprep.mubr.msk.bf16.mxu0 %vm2937_vm0, %v2936_v0  ;;  %v785_v33 = vsel %vm575_vm2, %v782_v22, %v784_v31 }
  0x70   : > { %2413 = vmatprep.mubr.msk.bf16.mxu1 %vm2937_vm0, %v2936_v0  ;;  %2430 = vmatpush3.bf16.msra.mxu0 %v2775_v61 }
  0x71   : > { %2466 = vmatpush3.bf16.msra.mxu1 %v2777_v62  ;;  %2431 = vmatprep.subr.bf16.mxu0 %v2936_v0  ;;  %v2149_v62 = vcombine.low %v1137_v55, %v3141_v6  ;;  %v2819_v55 = vld [vmem:[#allocation2 + $0x1b8] sm:$0xff]  }
  0x72   : > { %2467 = vmatprep.subr.bf16.mxu1 %v2936_v0 }
  0x74   : > { %2432 = vmatpush3.bf16.msra.mxu0 %v2778_v63  ;;  %v955_v63 = vor.u32 %v954_v58, %v951_v57  ;;  %v1540_v58 = vshrl.u32 %v3279_v51, 16 }
  0x75   : > { %2468 = vmatpush3.bf16.msra.mxu1 %v2779_v4  ;;  %2489 = vmatprep.subr.bf16.mxu0 %v2936_v0  ;;  %v1159_v4 = vrot.slane %v2149_v62, 2 }
  0x76   : > { %2378 = vmatmul.mubr.bf16.gmra.mrb[16].mxu0 %v301_v7  ;;  %2525 = vmatprep.subr.bf16.mxu1 %v2936_v0  ;;  %v964_v6 = vsel %vm947_vm3, %v955_v63, %v963_v1  ;;  %v2804_v7 = vld [vmem:[#allocation2 + $0x180] sm:$0xff]   ;;  %v1542_v2 = vrot.slane %v1540_v58, 2 }
  0x77   : > { %2414 = vmatmul.mubr.bf16.gmra.mrb[16].mxu1 %v3103_v45  ;;  %2433 = vmatprep.mubr.msk.bf16.mxu0 %vm2937_vm0, %v2936_v0  ;;  %v2799_v45 = vld [vmem:[%s3061_s26 + $0x2c] ss:$0 sps:$4 sm:$0x11]   ;;  %v1161_v11 = vsel %vm1158_vm4, %v1159_v4, %v1160_v5  ;;  %v3293_v4 = vld [vmem:[%s3061_s26 + $0x18] sm:$0xff]  }
  0x78   : > { %2469 = vmatprep.mubr.msk.bf16.mxu1 %vm2937_vm0, %v2936_v0  ;;  %v788_v52 = vrot.slane %v2799_v45, 1  ;;  %v3271_v45 = vld [vmem:[%s3061_s26 + $0xc] sm:$0xf]  ;;  %v1546_v8 = vor.u32 %v1545_v3, %v1542_v2  ;;  %v1549_v9 = vshrl.u32 %v3293_v4, 16 }
  0x7a   : > { %v789_v61 = vsel %vm575_vm2, %v786_v40, %v788_v52  ;;  %v2818_v52 = vld [vmem:[#allocation2 + $0x1f0] sm:$0xff]  }
  0x7e   : > { %2434 = vmatmul.mubr.bf16.vlgmr.msra.gmra.mrb[20].mxu0 %v578_v17  ;;  %v978_v17 = vshll.u32 %v3179_v27, 16 }
  0x7f   : > { %2470 = vmatmul.mubr.bf16.vlgmr.msra.gmra.mrb[20].mxu1 %v781_v19  ;;  %2490 = vmatpush3.bf16.msra.mxu0 %v2783_v16  ;;  %v975_v16 = vshrl.u32 %v3179_v27, 16  ;;  %v2808_v19 = vld [vmem:[#allocation2 + $0x1c8] sm:$0xff]   ;;  %v2813_v27 = vld [vmem:[#allocation2 + $0x1e0] sm:$0xff]  }
  0x80   : > { %2491 = vmatprep.subr.bf16.mxu0 %v2936_v0  ;;  %2437 = vmatprep.mubr.msk.bf16.mxu0 %vm2937_vm0, %v2936_v0  ;;  %v980_v22 = vrot.slane %v978_v17, 2 }
  0x81   : > { %2473 = vmatprep.mubr.msk.bf16.mxu1 %vm2937_vm0, %v2936_v0  ;;  %2526 = vmatpush3.bf16.msra.mxu1 %v2785_v20  ;;  %v973_v20 = vsel %vm947_vm3, %v963_v1, %v972_v14  ;;  %v977_v21 = vrot.slane %v975_v16, 1  ;;  %v1551_v16 = vrot.slane %v1549_v9, 2 }
  0x82   : > { %2527 = vmatprep.subr.bf16.mxu1 %v2936_v0 }
  0x83   : > { %2492 = vmatpush3.bf16.msra.mxu0 %v2784_v15  ;;  %v2807_v15 = vld [vmem:[#allocation2 + $0x190] sm:$0xff]   ;;  %v981_v18 = vor.u32 %v980_v22, %v977_v21 }
  0x84   : > { %2493 = vmatprep.subr.bf16.mxu0 %v2936_v0 }
  0x85   : > { %2528 = vmatpush3.bf16.msra.mxu1 %v2788_v23  ;;  %v1163_v23 = vsel %vm1158_vm4, %v1160_v5, %v1162_v10  ;;  %v982_v31 = vsel %vm947_vm3, %v972_v14, %v981_v18 }
  0x86   : > { %2438 = vmatmul.mubr.bf16.gmra.mrb[24].mxu0 %v580_v24  ;;  %2529 = vmatprep.subr.bf16.mxu1 %v2936_v0  ;;  %v2810_v24 = vld [vmem:[#allocation2 + $0x1d0] sm:$0xff]  }
  0x87   : > { %2474 = vmatmul.mubr.bf16.gmra.mrb[24].mxu1 %v783_v26  ;;  %2494 = vmatpush3.bf16.msra.mxu0 %v2787_v25  ;;  %v2809_v25 = vld [vmem:[#allocation2 + $0x198] sm:$0xff]   ;;  %v984_v26 = vshrl.u32 %v3194_v36, 16 }
  0x88   : > { %2441 = vmatprep.mubr.msk.bf16.mxu0 %vm2937_vm0, %v2936_v0  ;;  %2477 = vmatprep.mubr.msk.bf16.mxu1 %vm2937_vm0, %v2936_v0 }
  0x89   : > { %2495 = vmatprep.subr.bf16.mxu0 %v2936_v0  ;;  %2530 = vmatpush3.bf16.msra.mxu1 %v2791_v28  ;;  %v987_v28 = vshll.u32 %v3194_v36, 16 }
  0x8a   : > { %2531 = vmatprep.subr.bf16.mxu1 %v2936_v0 }
  0x8b   : > { %2496 = vmatpush3.bf16.msra.mxu0 %v2790_v30  ;;  %v2812_v30 = vld [vmem:[#allocation2 + $0x1d8] sm:$0xff]  }
  0x8c   : > { %2497 = vmatprep.subr.bf16.mxu0 %v2936_v0 }
  0x8d   : > { %2532 = vmatpush3.bf16.msra.mxu1 %v2793_v32  ;;  %v2811_v32 = vld [vmem:[#allocation2 + $0x1a0] sm:$0xff]  }
  0x8e   : > { %2442 = vmatmul.mubr.bf16.gmra.mrb[28].mxu0 %v582_v34  ;;  %2533 = vmatprep.subr.bf16.mxu1 %v2936_v0  ;;  %v986_v34 = vrot.slane %v984_v26, 1 }
  0x8f   : > { %2478 = vmatmul.mubr.bf16.gmra.mrb[28].mxu1 %v785_v33  ;;  %2498 = vmatpush3.bf16.msra.mxu0 %v2792_v35  ;;  %v989_v35 = vrot.slane %v987_v28, 2  ;;  %v2817_v33 = vld [vmem:[%s3061_s26 + $0x2c] ss:$0 sps:$4 sm:$0x33]  }
  0x90   : > { %2445 = vmatprep.mubr.msk.bf16.mxu0 %vm2937_vm0, %v2936_v0  ;;  %2481 = vmatprep.mubr.msk.bf16.mxu1 %vm2937_vm0, %v2936_v0  ;;  %v993_v40 = vshrl.u32 %v2817_v33, 16  ;;  %v3322_v28 = vld [vmem:[%s3061_s26 + $0x28] sm:$0xff]  }
  0x91   : > { %2499 = vmatprep.subr.bf16.mxu0 %v2936_v0  ;;  %2534 = vmatpush3.bf16.msra.mxu1 %v2795_v37  ;;  %v1165_v37 = vsel %vm1158_vm4, %v1162_v10, %v1164_v29  ;;  %v990_v38 = vor.u32 %v989_v35, %v986_v34  ;;  %v3307_v10 = vld [vmem:[%s3061_s26 + $0x20] sm:$0xff]   ;;  %v1570_v34 = vshll.u32 %v3322_v28, 16 }
  0x92   : > { %2535 = vmatprep.subr.bf16.mxu1 %v2936_v0  ;;  %v995_v47 = vrot.slane %v993_v40, 1  ;;  %v1558_v21 = vshrl.u32 %v3307_v10, 16  ;;  %v1561_v22 = vshll.u32 %v3307_v10, 16  ;;  %v1369_v40 = vrot.slane %v3322_v28, 2 }
  0x93   : > { %2500 = vmatpush3.bf16.msra.mxu0 %v2796_v39  ;;  %v2814_v39 = vld [vmem:[#allocation2 + $0x1a8] sm:$0xff]  }
  0x94   : > { %2501 = vmatprep.subr.bf16.mxu0 %v2936_v0  ;;  %v1563_v26 = vrot.slane %v1561_v22, 3 }
  0x95   : > { %2536 = vmatpush3.bf16.msra.mxu1 %v2797_v41  ;;  %v996_v41 = vshll.u32 %v2817_v33, 16 }
  0x96   : > { %2446 = vmatmul.mubr.bf16.gmra.mrb[32].mxu0 %v584_v42  ;;  %2537 = vmatprep.subr.bf16.mxu1 %v2936_v0  ;;  %v1166_v42 = vrot.slane %v3194_v36, 2 }
  0x97   : > { %2482 = vmatmul.mubr.bf16.gmra.mrb[32].mxu1 %v787_v43  ;;  %2449 = vmatprep.mubr.msk.bf16.mxu0 %vm2937_vm0, %v2936_v0  ;;  %v2815_v43 = vld [vmem:[#allocation2 + $0x1e8] sm:$0xff]   ;;  %v998_v48 = vrot.slane %v996_v41, 2 }
  0x98   : > { %2485 = vmatprep.mubr.msk.bf16.mxu1 %vm2937_vm0, %v2936_v0  ;;  %2502 = vmatpush3.bf16.msra.mxu0 %v2798_v44  ;;  %v1306_v44 = vld [vmem:[%s3061_s26 + $0x8] sm:$0xc]  ;;  %v1167_v49 = vsel %vm1158_vm4, %v1164_v29, %v1166_v42  ;;  %v1367_v29 = vrot.slane %v3307_v10, 2  ;;  %v2831_v41 = vld [vmem:[#allocation2 + $0x228] sm:$0xff]  }
  0x99   : > { %2538 = vmatpush3.bf16.msra.mxu1 %v2800_v46  ;;  %2503 = vmatprep.subr.bf16.mxu0 %v2936_v0  ;;  %v991_v46 = vsel %vm947_vm3, %v981_v18, %v990_v38  ;;  %v2158_v36 = vcombine.low %v1306_v44, %v3271_v45 }
  0x9a   : > { %2539 = vmatprep.subr.bf16.mxu1 %v2936_v0 }
  0x9b   : > { %v1535_v57 = vshll.u32 %v2158_v36, 16  ;;  %v1362_v5 = vrot.slane %v2158_v36, 2 }
  0x9c   : > { %2504 = vmatpush3.bf16.msra.mxu0 %v2801_v53  ;;  %v999_v53 = vor.u32 %v998_v48, %v995_v47  ;;  %v2833_v47 = vld [vmem:[%s3061_s26 + $0x30] ss:$0 sps:$4 sm:$0x33]  }
  0x9d   : > { %2540 = vmatpush3.bf16.msra.mxu1 %v2802_v54  ;;  %2561 = vmatprep.subr.bf16.mxu0 %v2936_v0  ;;  %v1168_v54 = vrot.slane %v2817_v33, 2  ;;  %v1537_v1 = vrot.slane %v1535_v57, 3  ;;  %v2829_v33 = vld [vmem:[#allocation2 + $0x220] sm:$0xff]  }
  0x9e   : > { %2450 = vmatmul.mubr.bf16.gmra.mrb[36].mxu0 %v586_v56  ;;  %2597 = vmatprep.subr.bf16.mxu1 %v2936_v0  ;;  %v1532_v56 = vshrl.u32 %v2158_v36, 16 }
  0x9f   : > { %2486 = vmatmul.mubr.bf16.gmra.mrb[36].mxu1 %v789_v61  ;;  %2505 = vmatprep.mubr.msk.bf16.mxu0 %vm2937_vm0, %v2936_v0  ;;  %v1000_v61 = vsel %vm947_vm3, %v990_v38, %v999_v53  ;;  %v1169_v62 = vsel %vm1158_vm4, %v1166_v42, %v1168_v54  ;;  %v1572_v38 = vrot.slane %v1570_v34, 3  ;;  %v2835_v54 = vld [vmem:[#allocation2 + $0x238] sm:$0xff]  }
  0xa0   : > { %2541 = vmatprep.mubr.msk.bf16.mxu1 %vm2937_vm0, %v2936_v0  ;;  %v1534_v63 = vrot.slane %v1532_v56, 2 }
  0xa6   : > { %2506 = vmatmul.mubr.bf16.vlgmr.msra.gmra.mrb[40].mxu0 %v964_v6  ;;  %v1363_v6 = vrot.slane %v3279_v51, 2 }
  0xa7   : > { %2542 = vmatmul.mubr.bf16.vlgmr.msra.gmra.mrb[40].mxu1 %v1161_v11  ;;  %2562 = vmatpush3.bf16.msra.mxu0 %v2804_v7  ;;  %v1538_v7 = vor.u32 %v1537_v1, %v1534_v63  ;;  %v1552_v11 = vshll.u32 %v3293_v4, 16  ;;  %v1745_v1 = vrot.slane %v3293_v4, 3 }
  0xa8   : > { %2563 = vmatprep.subr.bf16.mxu0 %v2936_v0  ;;  %2509 = vmatprep.mubr.msk.bf16.mxu0 %vm2937_vm0, %v2936_v0 }
  0xa9   : > { %2545 = vmatprep.mubr.msk.bf16.mxu1 %vm2937_vm0, %v2936_v0  ;;  %2598 = vmatpush3.bf16.msra.mxu1 %v2806_v12  ;;  %v1364_v12 = vsel %vm1158_vm4, %v1362_v5, %v1363_v6  ;;  %v1547_v14 = vsel %vm1530_vm5, %v1538_v7, %v1546_v8  ;;  %v1554_v17 = vrot.slane %v1552_v11, 3 }
  0xaa   : > { %2599 = vmatprep.subr.bf16.mxu1 %v2936_v0 }
  0xab   : > { %2564 = vmatpush3.bf16.msra.mxu0 %v2805_v13  ;;  %v2823_v13 = vld [vmem:[#allocation2 + $0x200] sm:$0xff]  }
  0xac   : > { %2565 = vmatprep.subr.bf16.mxu0 %v2936_v0 }
  0xad   : > { %2600 = vmatpush3.bf16.msra.mxu1 %v2808_v19  ;;  %v2824_v19 = vld [vmem:[#allocation2 + $0x208] sm:$0xff]  }
  0xae   : > { %2510 = vmatmul.mubr.bf16.gmra.mrb[44].mxu0 %v973_v20  ;;  %2601 = vmatprep.subr.bf16.mxu1 %v2936_v0  ;;  %v1365_v20 = vrot.slane %v3293_v4, 2 }
  0xaf   : > { %2546 = vmatmul.mubr.bf16.gmra.mrb[44].mxu1 %v1163_v23  ;;  %2566 = vmatpush3.bf16.msra.mxu0 %v2807_v15  ;;  %v1555_v15 = vor.u32 %v1554_v17, %v1551_v16 }
  0xb0   : > { %2513 = vmatprep.mubr.msk.bf16.mxu0 %vm2937_vm0, %v2936_v0  ;;  %2549 = vmatprep.mubr.msk.bf16.mxu1 %vm2937_vm0, %v2936_v0  ;;  %v1366_v23 = vsel %vm1158_vm4, %v1363_v6, %v1365_v20  ;;  %v1368_v35 = vsel %vm1158_vm4, %v1365_v20, %v1367_v29 }
  0xb1   : > { %2567 = vmatprep.subr.bf16.mxu0 %v2936_v0  ;;  %2602 = vmatpush3.bf16.msra.mxu1 %v2810_v24  ;;  %v2826_v24 = vld [vmem:[#allocation2 + $0x210] sm:$0xff]   ;;  %v1556_v18 = vsel %vm1530_vm5, %v1546_v8, %v1555_v15 }
  0xb2   : > { %2603 = vmatprep.subr.bf16.mxu1 %v2936_v0 }
  0xb3   : > { %2568 = vmatpush3.bf16.msra.mxu0 %v2809_v25  ;;  %v1560_v25 = vrot.slane %v1558_v21, 2 }
  0xb4   : > { %2569 = vmatprep.subr.bf16.mxu0 %v2936_v0 }
  0xb5   : > { %2604 = vmatpush3.bf16.msra.mxu1 %v2812_v30  ;;  %v2828_v30 = vld [vmem:[#allocation2 + $0x218] sm:$0xff]  }
  0xb6   : > { %2514 = vmatmul.mubr.bf16.gmra.mrb[48].mxu0 %v982_v31  ;;  %2605 = vmatprep.subr.bf16.mxu1 %v2936_v0  ;;  %v1564_v31 = vor.u32 %v1563_v26, %v1560_v25 }
  0xb7   : > { %2550 = vmatmul.mubr.bf16.gmra.mrb[48].mxu1 %v1165_v37  ;;  %2570 = vmatpush3.bf16.msra.mxu0 %v2811_v32  ;;  %v1567_v32 = vshrl.u32 %v3322_v28, 16 }
  0xb8   : > { %2517 = vmatprep.mubr.msk.bf16.mxu0 %vm2937_vm0, %v2936_v0  ;;  %2553 = vmatprep.mubr.msk.bf16.mxu1 %vm2937_vm0, %v2936_v0  ;;  %v1565_v37 = vsel %vm1530_vm5, %v1555_v15, %v1564_v31 }
  0xb9   : > { %2571 = vmatprep.subr.bf16.mxu0 %v2936_v0  ;;  %2606 = vmatpush3.bf16.msra.mxu1 %v2813_v27  ;;  %v1569_v27 = vrot.slane %v1567_v32, 2 }
  0xba   : > { %2607 = vmatprep.subr.bf16.mxu1 %v2936_v0 }
  0xbb   : > { %2572 = vmatpush3.bf16.msra.mxu0 %v2814_v39  ;;  %v3338_v39 = vld [vmem:[%s3061_s26 + $0x30] ss:$0 sps:$4 sm:$0x77]   ;;  %v1573_v42 = vor.u32 %v1572_v38, %v1569_v27 }
  0xbc   : > { %2573 = vmatprep.subr.bf16.mxu0 %v2936_v0  ;;  %v1579_v44 = vshll.u32 %v3338_v39, 16 }
  0xbd   : > { %2608 = vmatpush3.bf16.msra.mxu1 %v2815_v43  ;;  %v1576_v43 = vshrl.u32 %v3338_v39, 16  ;;  %v1574_v48 = vsel %vm1530_vm5, %v1564_v31, %v1573_v42 }
  0xbe   : > { %2518 = vmatmul.mubr.bf16.gmra.mrb[52].mxu0 %v991_v46  ;;  %2609 = vmatprep.subr.bf16.mxu1 %v2936_v0  ;;  %v1370_v46 = vsel %vm1158_vm4, %v1367_v29, %v1369_v40  ;;  %v1581_v36 = vrot.slane %v1579_v44, 3 }
  0xbf   : > { %2554 = vmatmul.mubr.bf16.gmra.mrb[52].mxu1 %v1167_v49  ;;  %2521 = vmatprep.mubr.msk.bf16.mxu0 %vm2937_vm0, %v2936_v0  ;;  %v2832_v49 = vld [vmem:[#allocation2 + $0x230] sm:$0xff]  }
  0xc0   : > { %2557 = vmatprep.mubr.msk.bf16.mxu1 %vm2937_vm0, %v2936_v0  ;;  %2574 = vmatpush3.bf16.msra.mxu0 %v2816_v50  ;;  %v1578_v50 = vrot.slane %v1576_v43, 2 }
  0xc1   : > { %2610 = vmatpush3.bf16.msra.mxu1 %v2818_v52  ;;  %2575 = vmatprep.subr.bf16.mxu0 %v2936_v0  ;;  %v1371_v52 = vrot.slane %v2833_v47, 2 }
  0xc2   : > { %2611 = vmatprep.subr.bf16.mxu1 %v2936_v0  ;;  %v1582_v53 = vor.u32 %v1581_v36, %v1578_v50 }
  0xc3   : > { %v1372_v56 = vsel %vm1158_vm4, %v1369_v40, %v1371_v52 }
  0xc4   : > { %2576 = vmatpush3.bf16.msra.mxu0 %v2819_v55  ;;  %v1720_v55 = vld [vmem:[%s3061_s26 + $0x8] sm:$0x8]  ;;  %v1583_v58 = vsel %vm1530_vm5, %v1573_v42, %v1582_v53 }
  0xc5   : > { %2612 = vmatpush3.bf16.msra.mxu1 %v2820_v60  ;;  %2633 = vmatprep.subr.bf16.mxu0 %v2936_v0  ;;  %v2181_v57 = vcombine.low %v1720_v55, %v3271_v45  ;;  %v1743_v60 = vrot.slane %v3279_v51, 3  ;;  %v1749_v45 = vrot.slane %v3322_v28, 3  ;;  %v1751_v51 = vrot.slane %v3338_v39, 3 }
  0xc6   : > { %2522 = vmatmul.mubr.bf16.gmra.mrb[56].mxu0 %v1000_v61  ;;  %2669 = vmatprep.subr.bf16.mxu1 %v2936_v0  ;;  %v1747_v61 = vrot.slane %v3307_v10, 3 }
  0xc7   : > { %2558 = vmatmul.mubr.bf16.gmra.mrb[56].mxu1 %v1169_v62  ;;  %2577 = vmatprep.mubr.msk.bf16.mxu0 %vm2937_vm0, %v2936_v0  ;;  %v1742_v59 = vrot.slane %v2181_v57, 3  ;;  %v1746_v2 = vsel %vm1741_vm6, %v1743_v60, %v1745_v1  ;;  %v1752_v3 = vsel %vm1741_vm6, %v1749_v45, %v1751_v51 }
  0xc8   : > { %2613 = vmatprep.mubr.msk.bf16.mxu1 %vm2937_vm0, %v2936_v0  ;;  %v1750_v63 = vsel %vm1741_vm6, %v1747_v61, %v1749_v45  ;;  %v1748_v5 = vsel %vm1741_vm6, %v1745_v1, %v1747_v61 }
  0xc9   : > { %v1744_v62 = vsel %vm1741_vm6, %v1742_v59, %v1743_v60 }
  0xce   : > { %2578 = vmatmul.mubr.bf16.vlgmr.msra.gmra.mrb[60].mxu0 %v1364_v12 }
  0xcf   : > { %2614 = vmatmul.mubr.bf16.vlgmr.msra.gmra.mrb[60].mxu1 %v1547_v14  ;;  %2634 = vmatpush3.bf16.msra.mxu0 %v2823_v13 }
  0xd0   : > { %2635 = vmatprep.subr.bf16.mxu0 %v2936_v0  ;;  %2581 = vmatprep.mubr.msk.bf16.mxu0 %vm2937_vm0, %v2936_v0 }
  0xd1   : > { %2617 = vmatprep.mubr.msk.bf16.mxu1 %vm2937_vm0, %v2936_v0  ;;  %2677 = vmatpush3.bf16.msra.mxu1 %v2823_v13 }
  0xd2   : > { %2670 = vmatprep.subr.bf16.mxu1 %v2936_v0 }
  0xd3   : > { %2636 = vmatpush3.bf16.msra.mxu0 %v2824_v19 }
  0xd4   : > { %2637 = vmatprep.subr.bf16.mxu0 %v2936_v0 }
  0xd5   : > { %2678 = vmatpush3.bf16.msra.mxu1 %v2824_v19 }
  0xd6   : > { %2582 = vmatmul.mubr.bf16.gmra.mrb[64].mxu0 %v1366_v23  ;;  %2671 = vmatprep.subr.bf16.mxu1 %v2936_v0 }
  0xd7   : > { %2618 = vmatmul.mubr.bf16.gmra.mrb[64].mxu1 %v1556_v18  ;;  %2638 = vmatpush3.bf16.msra.mxu0 %v2826_v24 }
  0xd8   : > { %2585 = vmatprep.mubr.msk.bf16.mxu0 %vm2937_vm0, %v2936_v0  ;;  %2621 = vmatprep.mubr.msk.bf16.mxu1 %vm2937_vm0, %v2936_v0 }
  0xd9   : > { %2639 = vmatprep.subr.bf16.mxu0 %v2936_v0  ;;  %2679 = vmatpush3.bf16.msra.mxu1 %v2826_v24 }
  0xda   : > { %2672 = vmatprep.subr.bf16.mxu1 %v2936_v0 }
  0xdb   : > { %2640 = vmatpush3.bf16.msra.mxu0 %v2828_v30 }
  0xdc   : > { %2641 = vmatprep.subr.bf16.mxu0 %v2936_v0 }
  0xdd   : > { %2680 = vmatpush3.bf16.msra.mxu1 %v2828_v30 }
  0xde   : > { %2586 = vmatmul.mubr.bf16.gmra.mrb[68].mxu0 %v1368_v35  ;;  %2673 = vmatprep.subr.bf16.mxu1 %v2936_v0 }
  0xdf   : > { %2622 = vmatmul.mubr.bf16.gmra.mrb[68].mxu1 %v1565_v37  ;;  %2642 = vmatpush3.bf16.msra.mxu0 %v2829_v33 }
  0xe0   : > { %2589 = vmatprep.mubr.msk.bf16.mxu0 %vm2937_vm0, %v2936_v0  ;;  %2625 = vmatprep.mubr.msk.bf16.mxu1 %vm2937_vm0, %v2936_v0 }
  0xe1   : > { %2681 = vmatpush3.bf16.msra.mxu1 %v2829_v33  ;;  %2643 = vmatprep.subr.bf16.mxu0 %v2936_v0 }
  0xe2   : > { %2674 = vmatprep.subr.bf16.mxu1 %v2936_v0 }
  0xe3   : > { %2644 = vmatpush3.bf16.msra.mxu0 %v2831_v41 }
  0xe4   : > { %2645 = vmatprep.subr.bf16.mxu0 %v2936_v0 }
  0xe5   : > { %2682 = vmatpush3.bf16.msra.mxu1 %v2831_v41 }
  0xe6   : > { %2590 = vmatmul.mubr.bf16.gmra.mrb[72].mxu0 %v1370_v46  ;;  %2675 = vmatprep.subr.bf16.mxu1 %v2936_v0 }
  0xe7   : > { %2626 = vmatmul.mubr.bf16.gmra.mrb[72].mxu1 %v1574_v48  ;;  %2593 = vmatprep.mubr.msk.bf16.mxu0 %vm2937_vm0, %v2936_v0 }
  0xe8   : > { %2629 = vmatprep.mubr.msk.bf16.mxu1 %vm2937_vm0, %v2936_v0  ;;  %2646 = vmatpush3.bf16.msra.mxu0 %v2832_v49 }
  0xe9   : > { %2683 = vmatpush3.bf16.msra.mxu1 %v2832_v49  ;;  %2647 = vmatprep.subr.bf16.mxu0 %v2936_v0 }
  0xea   : > { %2676 = vmatprep.subr.bf16.mxu1 %v2936_v0 }
  0xec   : > { %2648 = vmatpush3.bf16.msra.mxu0 %v2835_v54 }
  0xed   : > { %2684 = vmatpush3.bf16.msra.mxu1 %v2835_v54 }
  0xee   : > { %2594 = vmatmul.mubr.bf16.gmra.mrb[76].mxu0 %v1372_v56 }
  0xef   : > { %2630 = vmatmul.mubr.bf16.gmra.mrb[76].mxu1 %v1583_v58  ;;  %2649 = vmatprep.mubr.msk.bf16.mxu0 %vm2937_vm0, %v2936_v0 }
  0xf0   : > { %2661 = vmatprep.mubr.msk.bf16.mxu1 %vm2937_vm0, %v2936_v0 }
  0xf6   : > { %2650 = vmatmul.mubr.bf16.vlgmr.msra.gmra.mrb[80].mxu0 %v1744_v62 }
  0xf7   : > { %2662 = vmatmul.mubr.bf16.vlgmr.msra.gmra.mrb[80].mxu1 %v1750_v63  ;;  %2653 = vmatprep.mubr.msk.bf16.mxu0 %vm2937_vm0, %v2936_v0 }
  0xf8   : > { %2665 = vmatprep.mubr.msk.bf16.mxu1 %vm2937_vm0, %v2936_v0 }
  0xfe   : > { %2654 = vmatmul.mubr.bf16.gmra.mrb[84].mxu0 %v1746_v2 }
  0xff   : > { %2666 = vmatmul.mubr.bf16.gmra.mrb[84].mxu1 %v1752_v3  ;;  %2657 = vmatprep.mubr.msk.bf16.mxu0 %vm2937_vm0, %v2936_v0 }
 0x106   : > { %2658 = vmatmul.mubr.bf16.gmra.mrb[88].mxu0 %v1748_v5 }
 0x129   : > { %v389_v6 = vpop.f32.mrb[0].mxu0  ;;  %v515_v7 = vpop.f32.mrb[0].mxu1 }
 0x12a   : > { %v2363_v4 = vpop.f32.mrb[1].mxu0  ;;  %v516_v8 = vadd.f32 %v515_v7, %v389_v6  ;;  %v2399_v9 = vpop.f32.mrb[1].mxu1 }
 0x12b   : > { %v392_v11 = vpop.f32.mrb[2].mxu0  ;;  %v518_v12 = vpop.f32.mrb[2].mxu1 }
 0x12c   : > { %v2364_v13 = vpop.f32.mrb[3].mxu0  ;;  %v519_v14 = vadd.f32 %v518_v12, %v392_v11  ;;  %v2400_v16 = vpop.f32.mrb[3].mxu1 }
 0x131   : > { %v397_v17 = vpop.f32.mrb[4].mxu0 }
 0x132   : > { %v523_v10 = vpop.f32.mrb[4].mxu1  ;;  %v2367_v19 = vpop.f32.mrb[5].mxu0 }
 0x133   : > { %v524_v20 = vadd.f32 %v523_v10, %v397_v17  ;;  %v2403_v15 = vpop.f32.mrb[5].mxu1  ;;  %v400_v21 = vpop.f32.mrb[6].mxu0 }
 0x134   : > { %v526_v0 = vpop.f32.mrb[6].mxu1  ;;  %v2368_v22 = vpop.f32.mrb[7].mxu0 }
 0x135   : > { %v527_v23 = vadd.f32 %v526_v0, %v400_v21  ;;  %v2404_v24 = vpop.f32.mrb[7].mxu1 }
 0x139   : > { %v405_v18 = vpop.f32.mrb[8].mxu0 }
 0x13a   : > { %v531_v25 = vpop.f32.mrb[8].mxu1  ;;  %v2371_v26 = vpop.f32.mrb[9].mxu0 }
 0x13b   : > { %v532_v28 = vadd.f32 %v531_v25, %v405_v18  ;;  %v2407_v29 = vpop.f32.mrb[9].mxu1  ;;  %v408_v30 = vpop.f32.mrb[10].mxu0 }
 0x13c   : > { %v534_v31 = vpop.f32.mrb[10].mxu1  ;;  %v2372_v32 = vpop.f32.mrb[11].mxu0 }
 0x13d   : > { %v535_v34 = vadd.f32 %v534_v31, %v408_v30  ;;  %v2408_v35 = vpop.f32.mrb[11].mxu1 }
 0x141   : > { %v413_v33 = vpop.f32.mrb[12].mxu0 }
 0x142   : > { %v539_v37 = vpop.f32.mrb[12].mxu1  ;;  %v2375_v27 = vpop.f32.mrb[13].mxu0 }
 0x143   : > { %v540_v38 = vadd.f32 %v539_v37, %v413_v33  ;;  %v2411_v39 = vpop.f32.mrb[13].mxu1  ;;  %v416_v40 = vpop.f32.mrb[14].mxu0 }
 0x144   : > { %v542_v41 = vpop.f32.mrb[14].mxu1  ;;  %v2376_v42 = vpop.f32.mrb[15].mxu0 }
 0x145   : > { %v543_v43 = vadd.f32 %v542_v41, %v416_v40  ;;  %v2412_v44 = vpop.f32.mrb[15].mxu1 }
 0x149   : > { %v421_v46 = vpop.f32.mrb[16].mxu0 }
 0x14a   : > { %v547_v47 = vpop.f32.mrb[16].mxu1  ;;  %v2379_v48 = vpop.f32.mrb[17].mxu0 }
 0x14b   : > { %v548_v49 = vadd.f32 %v547_v47, %v421_v46  ;;  %v2415_v50 = vpop.f32.mrb[17].mxu1  ;;  %v424_v36 = vpop.f32.mrb[18].mxu0 }
 0x14c   : > { %v550_v52 = vpop.f32.mrb[18].mxu1  ;;  %v2380_v53 = vpop.f32.mrb[19].mxu0 }
 0x14d   : > { %v551_v54 = vadd.f32 %v550_v52, %v424_v36  ;;  %v2416_v55 = vpop.f32.mrb[19].mxu1 }
 0x151   : > { %v674_v56 = vpop.f32.mrb[20].mxu0 }
 0x152   : > { %v713_v57 = vadd.f32 %v674_v56, %v516_v8  ;;  %v2435_v58 = vpop.f32.mrb[21].mxu0  ;;  %v877_v59 = vpop.f32.mrb[20].mxu1 }
 0x153   : > { %v677_v60 = vpop.f32.mrb[22].mxu0  ;;  %v2471_v61 = vpop.f32.mrb[21].mxu1 }
 0x154   : > { %v714_v45 = vadd.f32 %v677_v60, %v519_v14  ;;  %v916_v62 = vadd.f32 %v877_v59, %v713_v57  ;;  %v2436_v63 = vpop.f32.mrb[23].mxu0  ;;  %v880_v1 = vpop.f32.mrb[22].mxu1 }
 0x155   : > { %v2472_v51 = vpop.f32.mrb[23].mxu1 }
 0x156   : > { %v917_v2 = vadd.f32 %v880_v1, %v714_v45 }
 0x159   : > { %v682_v3 = vpop.f32.mrb[24].mxu0 }
 0x15a   : > { %v715_v5 = vadd.f32 %v682_v3, %v524_v20  ;;  %v2439_v6 = vpop.f32.mrb[25].mxu0  ;;  %v885_v7 = vpop.f32.mrb[24].mxu1 }
 0x15b   : > { %v685_v4 = vpop.f32.mrb[26].mxu0  ;;  %v2475_v9 = vpop.f32.mrb[25].mxu1 }
 0x15c   : > { %v716_v11 = vadd.f32 %v685_v4, %v527_v23  ;;  %v918_v12 = vadd.f32 %v885_v7, %v715_v5  ;;  %v2440_v13 = vpop.f32.mrb[27].mxu0  ;;  %v888_v8 = vpop.f32.mrb[26].mxu1 }
 0x15d   : > { %v2476_v16 = vpop.f32.mrb[27].mxu1 }
 0x15e   : > { %v919_v17 = vadd.f32 %v888_v8, %v716_v11 }
 0x161   : > { %v690_v10 = vpop.f32.mrb[28].mxu0 }
 0x162   : > { %v717_v19 = vadd.f32 %v690_v10, %v532_v28  ;;  %v2443_v14 = vpop.f32.mrb[29].mxu0  ;;  %v893_v15 = vpop.f32.mrb[28].mxu1 }
 0x163   : > { %v693_v21 = vpop.f32.mrb[30].mxu0  ;;  %v2479_v0 = vpop.f32.mrb[29].mxu1 }
 0x164   : > { %v718_v22 = vadd.f32 %v693_v21, %v535_v34  ;;  %v920_v24 = vadd.f32 %v893_v15, %v717_v19  ;;  %v2444_v18 = vpop.f32.mrb[31].mxu0  ;;  %v896_v20 = vpop.f32.mrb[30].mxu1 }
 0x165   : > { %v2480_v25 = vpop.f32.mrb[31].mxu1 }
 0x166   : > { %v921_v26 = vadd.f32 %v896_v20, %v718_v22 }
 0x169   : > { %v698_v29 = vpop.f32.mrb[32].mxu0 }
 0x16a   : > { %v719_v30 = vadd.f32 %v698_v29, %v540_v38  ;;  %v2447_v23 = vpop.f32.mrb[33].mxu0  ;;  %v901_v31 = vpop.f32.mrb[32].mxu1 }
 0x16b   : > { %v701_v32 = vpop.f32.mrb[34].mxu0  ;;  %v2483_v35 = vpop.f32.mrb[33].mxu1 }
 0x16c   : > { %v720_v33 = vadd.f32 %v701_v32, %v543_v43  ;;  %v922_v37 = vadd.f32 %v901_v31, %v719_v30  ;;  %v2448_v27 = vpop.f32.mrb[35].mxu0  ;;  %v904_v28 = vpop.f32.mrb[34].mxu1 }
 0x16d   : > { %v2484_v39 = vpop.f32.mrb[35].mxu1 }
 0x16e   : > { %v923_v40 = vadd.f32 %v904_v28, %v720_v33 }
 0x171   : > { %v706_v41 = vpop.f32.mrb[36].mxu0 }
 0x172   : > { %v721_v42 = vadd.f32 %v706_v41, %v548_v49  ;;  %v2451_v34 = vpop.f32.mrb[37].mxu0  ;;  %v909_v44 = vpop.f32.mrb[36].mxu1 }
 0x173   : > { %v709_v46 = vpop.f32.mrb[38].mxu0  ;;  %v2487_v47 = vpop.f32.mrb[37].mxu1 }
 0x174   : > { %v722_v48 = vadd.f32 %v709_v46, %v551_v54  ;;  %v924_v50 = vadd.f32 %v909_v44, %v721_v42  ;;  %v2452_v36 = vpop.f32.mrb[39].mxu0  ;;  %v912_v38 = vpop.f32.mrb[38].mxu1 }
 0x175   : > { %v2488_v52 = vpop.f32.mrb[39].mxu1 }
 0x176   : > { %v925_v53 = vadd.f32 %v912_v38, %v722_v48 }
 0x179   : > { %v1088_v55 = vpop.f32.mrb[40].mxu0 }
 0x17a   : > { %v1127_v56 = vadd.f32 %v1088_v55, %v916_v62  ;;  %v2507_v43 = vpop.f32.mrb[41].mxu0  ;;  %v1257_v57 = vpop.f32.mrb[40].mxu1 }
 0x17b   : > { %v1091_v58 = vpop.f32.mrb[42].mxu0  ;;  %v2543_v59 = vpop.f32.mrb[41].mxu1 }
 0x17c   : > { %v1128_v60 = vadd.f32 %v1091_v58, %v917_v2  ;;  %v1296_v61 = vadd.f32 %v1257_v57, %v1127_v56  ;;  %v2508_v45 = vpop.f32.mrb[43].mxu0  ;;  %v1260_v49 = vpop.f32.mrb[42].mxu1 }
 0x17d   : > { %v2544_v63 = vpop.f32.mrb[43].mxu1 }
 0x17e   : > { %v1297_v1 = vadd.f32 %v1260_v49, %v1128_v60 }
 0x181   : > { %v1096_v51 = vpop.f32.mrb[44].mxu0 }
 0x182   : > { %v1129_v3 = vadd.f32 %v1096_v51, %v918_v12  ;;  %v2511_v54 = vpop.f32.mrb[45].mxu0  ;;  %v1265_v5 = vpop.f32.mrb[44].mxu1 }
 0x183   : > { %v1099_v6 = vpop.f32.mrb[46].mxu0  ;;  %v2547_v7 = vpop.f32.mrb[45].mxu1 }
 0x184   : > { %v1130_v4 = vadd.f32 %v1099_v6, %v919_v17  ;;  %v1298_v9 = vadd.f32 %v1265_v5, %v1129_v3  ;;  %v2512_v11 = vpop.f32.mrb[47].mxu0  ;;  %v1268_v62 = vpop.f32.mrb[46].mxu1 }
 0x185   : > { %v2548_v13 = vpop.f32.mrb[47].mxu1 }
 0x186   : > { %v1299_v8 = vadd.f32 %v1268_v62, %v1130_v4 }
 0x189   : > { %v1104_v16 = vpop.f32.mrb[48].mxu0 }
 0x18a   : > { %v1131_v10 = vadd.f32 %v1104_v16, %v920_v24  ;;  %v2515_v2 = vpop.f32.mrb[49].mxu0  ;;  %v1273_v19 = vpop.f32.mrb[48].mxu1 }
 0x18b   : > { %v1107_v14 = vpop.f32.mrb[50].mxu0  ;;  %v2551_v15 = vpop.f32.mrb[49].mxu1 }
 0x18c   : > { %v1132_v21 = vadd.f32 %v1107_v14, %v921_v26  ;;  %v1300_v0 = vadd.f32 %v1273_v19, %v1131_v10  ;;  %v2516_v22 = vpop.f32.mrb[51].mxu0  ;;  %v1276_v12 = vpop.f32.mrb[50].mxu1 }
 0x18d   : > { %v2552_v18 = vpop.f32.mrb[51].mxu1 }
 0x18e   : > { %v1301_v20 = vadd.f32 %v1276_v12, %v1132_v21 }
 0x191   : > { %v1112_v25 = vpop.f32.mrb[52].mxu0 }
 0x192   : > { %v1133_v29 = vadd.f32 %v1112_v25, %v922_v37  ;;  %v2519_v17 = vpop.f32.mrb[53].mxu0  ;;  %v1281_v30 = vpop.f32.mrb[52].mxu1 }
 0x193   : > { %v1115_v23 = vpop.f32.mrb[54].mxu0  ;;  %v2555_v31 = vpop.f32.mrb[53].mxu1 }
 0x194   : > { %v1134_v32 = vadd.f32 %v1115_v23, %v923_v40  ;;  %v1302_v35 = vadd.f32 %v1281_v30, %v1133_v29  ;;  %v2520_v33 = vpop.f32.mrb[55].mxu0  ;;  %v1284_v24 = vpop.f32.mrb[54].mxu1 }
 0x195   : > { %v2556_v27 = vpop.f32.mrb[55].mxu1 }
 0x196   : > { %v1303_v28 = vadd.f32 %v1284_v24, %v1134_v32 }
 0x199   : > { %v1120_v39 = vpop.f32.mrb[56].mxu0 }
 0x19a   : > { %v1135_v41 = vadd.f32 %v1120_v39, %v924_v50  ;;  %v2523_v26 = vpop.f32.mrb[57].mxu0  ;;  %v1289_v42 = vpop.f32.mrb[56].mxu1 }
 0x19b   : > { %v1123_v34 = vpop.f32.mrb[58].mxu0  ;;  %v2559_v44 = vpop.f32.mrb[57].mxu1 }
 0x19c   : > { %v1136_v46 = vadd.f32 %v1123_v34, %v925_v53  ;;  %v1304_v47 = vadd.f32 %v1289_v42, %v1135_v41  ;;  %v2524_v48 = vpop.f32.mrb[59].mxu0  ;;  %v1292_v37 = vpop.f32.mrb[58].mxu1 }
 0x19d   : > { %v2560_v36 = vpop.f32.mrb[59].mxu1 }
 0x19e   : > { %v1305_v38 = vadd.f32 %v1292_v37, %v1136_v46 }
 0x1a1   : > { %v1460_v52 = vpop.f32.mrb[60].mxu0 }
 0x1a2   : > { %v1499_v55 = vadd.f32 %v1460_v52, %v1296_v61  ;;  %v2579_v40 = vpop.f32.mrb[61].mxu0  ;;  %v1671_v56 = vpop.f32.mrb[60].mxu1 }
 0x1a3   : > { %v1463_v43 = vpop.f32.mrb[62].mxu0  ;;  %v2615_v57 = vpop.f32.mrb[61].mxu1 }
 0x1a4   : > { %v1500_v58 = vadd.f32 %v1463_v43, %v1297_v1  ;;  %v1710_v59 = vadd.f32 %v1671_v56, %v1499_v55  ;;  %v2580_v60 = vpop.f32.mrb[63].mxu0  ;;  %v1674_v50 = vpop.f32.mrb[62].mxu1 }
 0x1a5   : > { %v2616_v45 = vpop.f32.mrb[63].mxu1 }
 0x1a6   : > { %v1711_v49 = vadd.f32 %v1674_v50, %v1500_v58 }
 0x1a9   : > { %v1468_v63 = vpop.f32.mrb[64].mxu0 }
 0x1aa   : > { %v1501_v51 = vadd.f32 %v1468_v63, %v1298_v9  ;;  %v2583_v53 = vpop.f32.mrb[65].mxu0  ;;  %v1679_v3 = vpop.f32.mrb[64].mxu1 }
 0x1ab   : > { %v1471_v54 = vpop.f32.mrb[66].mxu0  ;;  %v2619_v5 = vpop.f32.mrb[65].mxu1 }
 0x1ac   : > { %v1502_v6 = vadd.f32 %v1471_v54, %v1299_v8  ;;  %v3385_v7 = vadd.f32 %v1679_v3, %v1501_v51  ;;  %v2584_v61 = vpop.f32.mrb[67].mxu0  ;;  %v1682_v4 = vpop.f32.mrb[66].mxu1 }
 0x1ad   : > { %v2620_v11 = vpop.f32.mrb[67].mxu1 }
 0x1ae   : > { %v3387_v62 = vadd.f32 %v1682_v4, %v1502_v6 }
 0x1b1   : > { %v1476_v1 = vpop.f32.mrb[68].mxu0 }
 0x1b2   : > { %v1503_v13 = vadd.f32 %v1476_v1, %v1300_v0  ;;  %v2587_v16 = vpop.f32.mrb[69].mxu0  ;;  %v1687_v10 = vpop.f32.mrb[68].mxu1 }
 0x1b3   : > { %v1479_v2 = vpop.f32.mrb[70].mxu0  ;;  %v2623_v19 = vpop.f32.mrb[69].mxu1 }
 0x1b4   : > { %v1504_v14 = vadd.f32 %v1479_v2, %v1301_v20  ;;  %v3389_v9 = vadd.f32 %v1687_v10, %v1503_v13  ;;  %v2588_v15 = vpop.f32.mrb[71].mxu0  ;;  %v1690_v21 = vpop.f32.mrb[70].mxu1 }
 0x1b5   : > { %v2624_v22 = vpop.f32.mrb[71].mxu1 }
 0x1b6   : > { %v3391_v8 = vadd.f32 %v1690_v21, %v1504_v14 }
 0x1b9   : > { %v1484_v12 = vpop.f32.mrb[72].mxu0 }
 0x1ba   : > { %v1505_v18 = vadd.f32 %v1484_v12, %v1302_v35  ;;  %v2591_v25 = vpop.f32.mrb[73].mxu0  ;;  %v1695_v29 = vpop.f32.mrb[72].mxu1 }
 0x1bb   : > { %v1487_v17 = vpop.f32.mrb[74].mxu0  ;;  %v2627_v30 = vpop.f32.mrb[73].mxu1 }
 0x1bc   : > { %v1506_v23 = vadd.f32 %v1487_v17, %v1303_v28  ;;  %v1716_v0 = vadd.f32 %v1695_v29, %v1505_v18  ;;  %v2592_v31 = vpop.f32.mrb[75].mxu0  ;;  %v1698_v32 = vpop.f32.mrb[74].mxu1  ;;  %v3396_v28 = vld [vmem:[%s3506_s2] ss:$0 sm:$0xff] }
 0x1bd   : > { %v2628_v33 = vpop.f32.mrb[75].mxu1 }
 0x1be   : > { %v1717_v24 = vadd.f32 %v1698_v32, %v1506_v23 }
 0x1c1   : > { %v1492_v20 = vpop.f32.mrb[76].mxu0 }
 0x1c2   : > { %v1507_v27 = vadd.f32 %v1492_v20, %v1304_v47  ;;  %v2595_v39 = vpop.f32.mrb[77].mxu0  ;;  %v1703_v41 = vpop.f32.mrb[76].mxu1 }
 0x1c3   : > { %v1495_v26 = vpop.f32.mrb[78].mxu0  ;;  %v2631_v42 = vpop.f32.mrb[77].mxu1 }
 0x1c4   : > { %v1508_v34 = vadd.f32 %v1495_v26, %v1305_v38  ;;  %v1718_v44 = vadd.f32 %v1703_v41, %v1507_v27  ;;  %v2596_v35 = vpop.f32.mrb[79].mxu0  ;;  %v1706_v46 = vpop.f32.mrb[78].mxu1 }
 0x1c5   : > { %v2632_v48 = vpop.f32.mrb[79].mxu1 }
 0x1c6   : > { %v1719_v37 = vadd.f32 %v1706_v46, %v1508_v34 }
 0x1c9   : > { %v1840_v36 = vpop.f32.mrb[80].mxu0 }
 0x1ca   : > { %v1879_v52 = vadd.f32 %v1840_v36, %v1710_v59  ;;  %v1864_v47 = vpop.f32.mrb[80].mxu1  ;;  %v2651_v55 = vpop.f32.mrb[81].mxu0 }
 0x1cb   : > { %v1885_v40 = vadd.f32 %v1864_v47, %v1716_v0  ;;  %v2663_v56 = vpop.f32.mrb[81].mxu1  ;;  %v1843_v43 = vpop.f32.mrb[82].mxu0 }
 0x1cc   : > { %v1896_v38 = vadd.f32 %v3396_v28, %v1879_v52  ;;  %v1880_v57 = vadd.f32 %v1843_v43, %v1711_v49  ;;  %v1867_v58 = vpop.f32.mrb[82].mxu1  ;;  %v2652_v60 = vpop.f32.mrb[83].mxu0 }
 0x1cd   : > { %v1902_v50 = vadd.f32 %v3396_v28, %v1885_v40  ;;  %v1886_v45 = vadd.f32 %v1867_v58, %v1717_v24  ;;  %v2664_v63 = vpop.f32.mrb[83].mxu1 }
 0x1ce   : > { %v1897_v51 = vadd.f32 %v3396_v28, %v1880_v57  ;;  %v1906_v3 = vmax.f32 %v1896_v38, 0.0 }
 0x1cf   : > { %v1912_v59 = vmax.f32 %v1902_v50, 0.0  ;;  %v1903_v53 = vadd.f32 %v3396_v28, %v1886_v45 }
 0x1d0   : > { %v1907_v54 = vmax.f32 %v1897_v51, 0.0 }
 0x1d1   : > { %v2223_v5 = vpack.c.bf16 %v1912_v59, %v1912_v59  ;;  %v1913_v6 = vmax.f32 %v1903_v53, 0.0  ;;  %v1848_v49 = vpop.f32.mrb[84].mxu0 }
 0x1d2   : > { %v1916_v61 = vpack.c.bf16 %v1907_v54, %v1906_v3  ;;  %v1881_v4 = vadd.f32 %v1848_v49, %v3385_v7  ;;  %v1872_v11 = vpop.f32.mrb[84].mxu1  ;;  %v2655_v1 = vpop.f32.mrb[85].mxu0  ;;  %v2218_v17 = vpack.c.bf16 %v1907_v54, %v1907_v54 }
 0x1d3   : > { %v2224_v13 = vpack.c.bf16 %v1913_v6, %v1913_v6  ;;  %v1887_v16 = vadd.f32 %v1872_v11, %v1718_v44  ;;  %v2667_v10 = vpop.f32.mrb[85].mxu1  ;;  %v1851_v2 = vpop.f32.mrb[86].mxu0  ;;  %v2205_v22 = vrot.slane %v2223_v5, 9 }
 0x1d4   : > { %1921 = vst [vmem:[%s3406_s4] sm:$0xf] %v1916_v61  ;;  %v1898_v14 = vadd.f32 %v3396_v28, %v1881_v4  ;;  %v1882_v15 = vadd.f32 %v1851_v2, %v3387_v62  ;;  %v1875_v7 = vpop.f32.mrb[86].mxu1  ;;  %v2656_v21 = vpop.f32.mrb[87].mxu0  ;;  %v2193_v39 = vrot.slane %v2218_v17, 9 }
 0x1d5   : > { %v1975_v12 = vrot.slane %v2224_v13, 5  ;;  %v1904_v18 = vadd.f32 %v3396_v28, %v1887_v16  ;;  %v1888_v25 = vadd.f32 %v1875_v7, %v1719_v37  ;;  %v2668_v29 = vpop.f32.mrb[87].mxu1  ;;  %v2208_v35 = vrot.slane %v2224_v13, 10 }
 0x1d6   : > { %v1908_v30 = vmax.f32 %v1898_v14, 0.0  ;;  %v1899_v23 = vadd.f32 %v3396_v28, %v1882_v15 }
 0x1d7   : > { %v1976_v0 = vsel %vm3409_vm9, %v2205_v22, %v1975_v12  ;;  %v1914_v31 = vmax.f32 %v1904_v18, 0.0  ;;  %v1905_v62 = vadd.f32 %v3396_v28, %v1888_v25 }
 0x1d8   : > { %2206 = vst [vmem:[%s3406_s4 + $0x14] sm:$0xf] %v1976_v0  ;;  %v2219_v32 = vpack.c.bf16 %v1908_v30, %v1908_v30  ;;  %v1909_v33 = vmax.f32 %v1899_v23, 0.0 }
 0x1d9   : > { %v2225_v24 = vpack.c.bf16 %v1914_v31, %v1914_v31  ;;  %v1915_v20 = vmax.f32 %v1905_v62, 0.0  ;;  %v1856_v27 = vpop.f32.mrb[88].mxu0 }
 0x1da   : > { %v1933_v41 = vrot.slane %v2219_v32, 5  ;;  %v2220_v42 = vpack.c.bf16 %v1909_v33, %v1909_v33  ;;  %v1883_v34 = vadd.f32 %v1856_v27, %v3389_v9  ;;  %v2659_v44 = vpop.f32.mrb[89].mxu0  ;;  %v2196_v52 = vrot.slane %v2219_v32, 10 }
 0x1db   : > { %v1985_v46 = vrot.slane %v2225_v24, 6  ;;  %v2226_v48 = vpack.c.bf16 %v1915_v20, %v1915_v20  ;;  %v1859_v37 = vpop.f32.mrb[90].mxu0  ;;  %v2211_v43 = vrot.slane %v2225_v24, 11 }
 0x1dc   : > { %v1934_v36 = vsel %vm3409_vm9, %v2193_v39, %v1933_v41  ;;  %v1945_v47 = vrot.slane %v2220_v42, 6  ;;  %v1900_v9 = vadd.f32 %v3396_v28, %v1883_v34  ;;  %v2660_v40 = vpop.f32.mrb[91].mxu0  ;;  %v1884_v57 = vadd.f32 %v1859_v37, %v3391_v8 }
 0x1dd   : > { %2194 = vst [vmem:[%s3406_s4 + $0x4] sm:$0xf] %v1934_v36  ;;  %v1986_v56 = vsel %vm3422_vm14, %v2208_v35, %v1985_v46  ;;  %v1994_v38 = vrot.slane %v2226_v48, 7  ;;  %v2199_v51 = vrot.slane %v2220_v42, 11 }
 0x1de   : > { %2209 = vst [vmem:[%s3406_s4 + $0x18] sm:$0xf] %v1986_v56  ;;  %v1946_v58 = vsel %vm3422_vm14, %v2196_v52, %v1945_v47  ;;  %v1910_v60 = vmax.f32 %v1900_v9, 0.0  ;;  %v1901_v45 = vadd.f32 %v3396_v28, %v1884_v57 }
 0x1df   : > { %2197 = vst [vmem:[%s3406_s4 + $0x8] sm:$0xf] %v1946_v58  ;;  %v1995_v50 = vsel %vm3431_vm15, %v2211_v43, %v1994_v38 }
 0x1e0   : > { %2212 = vst [vmem:[%s3406_s4 + $0x1c] sm:$0xf] %v1995_v50  ;;  %v2221_v63 = vpack.c.bf16 %v1910_v60, %v1910_v60  ;;  %v1911_v8 = vmax.f32 %v1901_v45, 0.0 }
 0x1e2   : > { %v1958_v59 = vrot.slane %v2221_v63, 7  ;;  %v2222_v53 = vpack.c.bf16 %v1911_v8, %v1911_v8 }
 0x1e4   : > { %v1959_v28 = vsel %vm3431_vm15, %v2199_v51, %v1958_v59  ;;  %2202 = vst [vmem:[%s3406_s4 + $0x10] sm:$0xf] %v2222_v53 }
 0x1e5   : > { %2200 = vst [vmem:[%s3406_s4 + $0xc] sm:$0xf] %v1959_v28 }
 0x1e6   : > { %2878 = shalt.err (!%p2875_p7)
}
 0x1e7   : > { %s2879_s20 = scalar_lea.hbm %s3453_s9, 512  ;;  %s2883_s26 = scalar_lea.hbm %s3507_s3, 1024 }
 0x1e8   : > { %p2880_p8 = scmp.ne.s32.totalorder %s3453_s9, %s2879_s20  ;;  %p2884_p1 = scmp.lt.u32.totalorder %s3453_s9, %s3507_s3 }
 0x1e9   : > { %p2885_p0 = scmp.lt.u32.totalorder %s2883_s26, %s2879_s20  ;;  %p2887_p6 = scmp.lt.u32.totalorder %s2879_s20, %s3453_s9 }
 0x1ea   : > { %p2881_p11 = pnand %p2880_p8, %p3524_p9 }
 0x1eb   : > { %p2886_p5 = por %p2885_p0, %p2884_p1 }
 0x1ec   : > { %p2882_p13 = pneg %p2881_p11 }
 0x1ed   : > { %p2888_p10 = por %p2887_p6, %p2886_p5 }
 0x1ef   : > { %p2889_p12 = pnand %p2888_p10, %p2882_p13 }
 0x1f1   : > { %2892 = shalt.err (!%p2889_p12)
}
 0x1f2   : > { %s2939_s29 = smov 64   ;;  %s2940_s30 = smov 4  }
 0x1f3   : > { %2690 = dma.vmem_to_hbm [thread:$0]  (%p3524_p9), %s3455_s6, 512, %s3453_s9, %s3463_s16, %s2939_s29, %s2939_s29, %s2940_s30  }
 0x1f4 PF: > { %p2702_p2 = scmp.ge.s32.totalorder %s2931_s15, 2  ;;  %s2028_s4 = sand.u32 1, %s2919_s12  }
 0x1f5   : > { %p3525_p3 = scmp.ne.s32.totalorder %s3512_s23, 0  ;;  %s2029_s5 = scalar_lea.sflag [#allocation4], %s2028_s4 }
 0x1f7   : > { %p2697_p4 = pnand %p2702_p2, %p3525_p3 }
 0x1f9   : > { %2914 = dma.done.wait (!%p2697_p4), %s2029_s5, 512  }
 0x1fa   : > { %2916 = vsyncadd (!%p2697_p4), %s2029_s5, 4294966784  ;;  %p14_p7 = scmp.ge.s32.totalorder %s2986_s18, 4   ;;  %s3526_s12 = smov %s2923_s13 }
 0x1fb   : > { %s3527_s13 = smov %s2927_s14  ;;  %s3528_s14 = smov %s2997_s21 }
 0x1fc   : > { %s3529_s15 = smov %s2986_s18  ;;  %16 = sbr.rel (!%p14_p7) target bundleno = 4 (0x4), region = 87 }
 0x203   :  { %2034 = vsyncpa [#allocation3], 1 }
 0x204   :  { %2036 = vsyncpa [#allocation3 + $0x1], 1 }
 0x205   :  { %2037 = vsyncpa [#allocation4], 1 }
 0x206   :  { %2039 = vsyncpa [#allocation4 + $0x1], 1 }

</bundles_post_ra>
